<compile_context>
chip_gen: v5e
topology: v5e:2x2
jax: 0.10.0
libtpu: 0.0.40
codegen_flags: <defaults>
</compile_context>

<pallas_src>
import jax
import jax.numpy as jnp
import numpy as np
from jax.experimental import pallas as pl
from jax.experimental.pallas import tpu as pltpu

# ----------------------------- model config ---------------------------------
IN_DIM = 16
OUT_DIM = 12
FEATURE_DIM = 64            # EXPERT_HIDDEN_SIZE (divisible by 8 heads)
QUERY_NUM = 8
NUM_HEADS = 8
EXPERT_NUM = 2
GATING_HIDDEN_SIZE = 32
BATCH = 4

# ---------------------- packed-parameter slab layout -------------------------
# Lane-paired (1, E*F) parameter rows (expert e occupies lanes [e*F, (e+1)*F)).
VEC_NAMES = [
    "stage0_b",                        # fused in_proj + attn1 bias
    "ln1_1_g", "ln1_1_b",
    "mlp1_b2", "ln1_2_g", "ln1_2_b",
    "tb_b",                            # fused TB v_proj + out_proj bias
    "tb_ln1_g", "tb_ln1_b",
    "tb_mlp_b2", "tb_ln2_g", "tb_ln2_b",
    "a2_b",                            # fused attn2 v_proj + out_proj bias
    "ln2_1_g", "ln2_1_b",
    "mlp2_b2", "ln2_2_g", "ln2_2_b",
    "out_b",                           # out_proj bias, lanes [e*F, e*F+OUT)
]
VEC_ROW = {n: i for i, n in enumerate(VEC_NAMES)}
WOUT_STRIDE = 16                       # 8-aligned out_proj row stride/expert


# ------------------------------ fused kernel ---------------------------------
def _make_kernel(E):
    F = FEATURE_DIM
    EF = E * F
    GH = GATING_HIDDEN_SIZE

    def kernel(x_ref, g_w_ref, g_b_ref, w0_ref, wbd_ref, wmlp_ref, wout_ref,
               vec_ref, vec4_ref, out_ref):

        def elu(v):
            return jnp.where(v > 0, v, jnp.exp(jnp.minimum(v, 0.0)) - 1.0)

        def dot_t(a, w):      # a (M,K) . w (N,K) -> (M,N)   == a @ w.T
            return jax.lax.dot_general(a, w, (((1,), (1,)), ((), ())),
                                       preferred_element_type=jnp.float32)

        def dot_n(a, w):      # a (M,K) . w (K,N) -> (M,N)   == a @ w
            return jax.lax.dot_general(a, w, (((1,), (0,)), ((), ())),
                                       preferred_element_type=jnp.float32)

        def vec(name):        # lane-paired (1, EF) parameter row
            r = VEC_ROW[name]
            return vec_ref[r:r + 1, :]

        def lnorm(v, gname, bname, eps=1e-5):
            # Per-expert LayerNorm on the lane-packed (B, E*F) activation:
            # normalize each 64-lane half, re-concat, then a lane-dense affine.
            halves = []
            for e in range(E):
                h = v[:, e * F:(e + 1) * F]
                mu = jnp.mean(h, axis=-1, keepdims=True)
                var = jnp.mean((h - mu) ** 2, axis=-1, keepdims=True)
                halves.append((h - mu) * jax.lax.rsqrt(var + eps))
            vn = halves[0] if E == 1 else jnp.concatenate(halves, axis=-1)
            return vn * vec(gname) + vec(bname)

        def mlp(v, i, b2_name):
            # Linear(F->4F) + ELU + Linear(4F->F); per-expert lane-dense weights.
            parts = []
            for e in range(E):
                a_e = v[:, e * F:(e + 1) * F]
                base = (e * 3 + i) * 2 * F
                w1t = wmlp_ref[base:base + F, :]            # (F, 4F) = W1^T
                w2 = wmlp_ref[base + F:base + 2 * F, :]     # (F, 4F) = W2
                b1 = vec4_ref[e * 3 + i:e * 3 + i + 1, :]   # (1, 4F)
                h = elu(dot_n(a_e, w1t) + b1)
                parts.append(dot_t(h, w2))
            m = parts[0] if E == 1 else jnp.concatenate(parts, axis=-1)
            return m + vec(b2_name)

        x = x_ref[...]                                      # (B, IN_DIM)

        # ------------------------ gating MLP + softmax ------------------------
        if E > 1:
            g1 = elu(dot_t(x, g_w_ref[0:GH, 0:IN_DIM]) + g_b_ref[0:1, :])
            g2 = elu(dot_t(g1, g_w_ref[GH:2 * GH, :]) + g_b_ref[1:2, :])
            logits = dot_t(g2, g_w_ref[2 * GH:2 * GH + E, :]) + g_b_ref[2:3, 0:E]
            logits = logits - jnp.max(logits, axis=-1, keepdims=True)
            eg = jnp.exp(logits)
            gate = eg / jnp.sum(eg, axis=-1, keepdims=True)  # (B, E)

        # -- stage 0: in_proj + attn1 (kv length 1 => softmax == 1), pre-fused --
        a = dot_t(x, w0_ref[...]) + vec("stage0_b")          # (B, E*F)
        a = lnorm(a, "ln1_1_g", "ln1_1_b")
        a = lnorm(a + mlp(a, 0, "mlp1_b2"), "ln1_2_g", "ln1_2_b")

        # -- TransformerBlock: self-attn over identical tokens == out(v(a)) -----
        t = dot_n(a, wbd_ref[0:EF, :]) + vec("tb_b")         # block-diag, 1 push
        a = lnorm(a + t, "tb_ln1_g", "tb_ln1_b")
        a = lnorm(a + mlp(a, 1, "tb_mlp_b2"), "tb_ln2_g", "tb_ln2_b")

        # -- attn2: uniform softmax over identical tokens == out(v(a)) ----------
        z = dot_n(a, wbd_ref[EF:2 * EF, :]) + vec("a2_b")    # block-diag, 1 push
        z = lnorm(z, "ln2_1_g", "ln2_1_b")
        z = lnorm(z + mlp(z, 2, "mlp2_b2"), "ln2_2_g", "ln2_2_b")

        # -- per-expert output projection + gate-weighted sum -------------------
        out_b = vec("out_b")
        acc = None
        for e in range(E):
            z_e = z[:, e * F:(e + 1) * F]
            w_e = wout_ref[e * WOUT_STRIDE:e * WOUT_STRIDE + OUT_DIM, :]
            y_e = dot_t(z_e, w_e) + out_b[:, e * F:e * F + OUT_DIM]
            if E > 1:
                y_e = y_e * gate[:, e:e + 1]
            acc = y_e if acc is None else acc + y_e
        out_ref[...] = acc

    return kernel


_VMEM = pl.BlockSpec(memory_space=pltpu.MemorySpace.VMEM)


def make_forward(expert_num):
    kernel = _make_kernel(expert_num)

    @jax.jit
    def forward(x, packed):
        # Single launch, no grid: the whole working set (~1 MiB of lane-dense
        # slabs) fits VMEM on every generation; a grid would only add the
        # ~0.35 us/step fixed cost with nothing to pipeline.
        # TODO(synk): if this module is invoked every step with static weights,
        # keep the slabs VMEM-resident across calls (cross-call semaphore/VMEM
        # output pattern) instead of re-DMAing ~1 MiB per invocation.
        return pl.pallas_call(
            kernel,
            out_shape=jax.ShapeDtypeStruct((x.shape[0], OUT_DIM), jnp.float32),
            in_specs=[_VMEM] * 9,
            out_specs=_VMEM,
        )(x, packed["g_w"], packed["g_b"], packed["w0"], packed["wbd"],
          packed["wmlp"], packed["wout"], packed["vec"], packed["vec4"])

    return forward


# --------------------------- parameter packing --------------------------------
def _f64(a):
    return np.asarray(a, dtype=np.float64)


def _fuse_vo(in_w, in_b, out_w, out_b):
    """out_proj(v_proj(.)) of an nn.MultiheadAttention -> single (W, b)."""
    F = FEATURE_DIM
    wv = _f64(in_w)[2 * F:3 * F, :]
    bv = _f64(in_b)[0, 2 * F:3 * F]
    wo = _f64(out_w)
    bo = _f64(out_b)[0]
    return wo @ wv, wo @ bv + bo


def pack_params(gating_params, expert_params_list):
    """Pack all LIVE parameters into 8 lane-dense slabs.

    query1/query2 and every q/k projection are dead under the exact
    degenerate-QN collapse and are not packed (nor DMA'd) at all.
    """
    E = len(expert_params_list)
    F = FEATURE_DIM

    stage0_w, stage0_b, tb_w, tb_b, a2_w, a2_b = [], [], [], [], [], []
    for p in expert_params_list:
        wa, ba = _fuse_vo(p["a1_in_w"], p["a1_in_b"], p["a1_out_w"], p["a1_out_b"])
        w_in, b_in = _f64(p["in_proj_w"]), _f64(p["in_proj_b"])[0]
        stage0_w.append(wa @ w_in)              # (F, IN)
        stage0_b.append(wa @ b_in + ba)         # (F,)
        w, b = _fuse_vo(p["tb_in_w"], p["tb_in_b"], p["tb_out_w"], p["tb_out_b"])
        tb_w.append(w); tb_b.append(b)
        w, b = _fuse_vo(p["a2_in_w"], p["a2_in_b"], p["a2_out_w"], p["a2_out_b"])
        a2_w.append(w); a2_b.append(b)

    w0 = np.concatenate(stage0_w, axis=0).astype(np.float32)      # (E*F, IN)

    def block_diag(mats):                                          # (E*F, E*F)
        m = np.zeros((E * F, E * F), np.float32)
        for e, w in enumerate(mats):
            m[e * F:(e + 1) * F, e * F:(e + 1) * F] = np.asarray(w.T, np.float32)
        return m

    wbd = np.concatenate([block_diag(tb_w), block_diag(a2_w)], axis=0)

    mlps = [("mlp1_w1", "mlp1_w2"), ("tb_mlp_w1", "tb_mlp_w2"),
            ("mlp2_w1", "mlp2_w2")]
    b1_names = ["mlp1_b1", "tb_mlp_b1", "mlp2_b1"]
    wmlp = np.zeros((E * 3 * 2 * F, 4 * F), np.float32)
    vec4 = np.zeros((E * 3, 4 * F), np.float32)
    for e, p in enumerate(expert_params_list):
        for i, (n1, n2) in enumerate(mlps):
            base = (e * 3 + i) * 2 * F
            wmlp[base:base + F, :] = np.asarray(p[n1], np.float32).T       # W1^T
            wmlp[base + F:base + 2 * F, :] = np.asarray(p[n2], np.float32)  # W2
            vec4[e * 3 + i, :] = np.asarray(p[b1_names[i]], np.float32)[0]

    wout = np.zeros((E * WOUT_STRIDE, F), np.float32)
    for e, p in enumerate(expert_params_list):
        wout[e * WOUT_STRIDE:e * WOUT_STRIDE + OUT_DIM, :] = np.asarray(
            p["out_proj_w"], np.float32)

    vec = np.zeros((len(VEC_NAMES), E * F), np.float32)

    def put(name, e, v):
        v = np.asarray(v, np.float32).reshape(-1)
        vec[VEC_ROW[name], e * F:e * F + v.shape[0]] = v

    for e, p in enumerate(expert_params_list):
        put("stage0_b", e, stage0_b[e])
        put("tb_b", e, tb_b[e])
        put("a2_b", e, a2_b[e])
        for nm in ["ln1_1_g", "ln1_1_b", "mlp1_b2", "ln1_2_g", "ln1_2_b",
                   "tb_ln1_g", "tb_ln1_b", "tb_mlp_b2", "tb_ln2_g", "tb_ln2_b",
                   "ln2_1_g", "ln2_1_b", "mlp2_b2", "ln2_2_g", "ln2_2_b"]:
            put(nm, e, p[nm])
        put("out_b", e, p["out_proj_b"])

    GH = GATING_HIDDEN_SIZE
    g_w = np.zeros((2 * GH + E, GH), np.float32)
    g_b = np.zeros((3, GH), np.float32)
    if E > 1:
        g_w[0:GH, 0:IN_DIM] = np.asarray(gating_params["w1"], np.float32)
        g_w[GH:2 * GH, :] = np.asarray(gating_params["w2"], np.float32)
        g_w[2 * GH:2 * GH + E, :] = np.asarray(gating_params["w3"], np.float32)
        g_b[0, :] = np.asarray(gating_params["b1"], np.float32)[0]
        g_b[1, :] = np.asarray(gating_params["b2"], np.float32)[0]
        g_b[2, 0:E] = np.asarray(gating_params["b3"], np.float32)[0]

    dev = lambda a: jnp.asarray(a, jnp.float32)
    return {"g_w": dev(g_w), "g_b": dev(g_b), "w0": dev(w0), "wbd": dev(wbd),
            "wmlp": dev(wmlp), "wout": dev(wout), "vec": dev(vec),
            "vec4": dev(vec4)}


# -------------------- pure-JAX reference (original math) ---------------------
_HI = jax.lax.Precision.HIGHEST


def linear(v, w, b):
    shp = v.shape
    v2 = v.reshape(-1, shp[-1])
    y = jax.lax.dot_general(v2, w, dimension_numbers=(((1,), (1,)), ((), ())),
                            precision=_HI,
                            preferred_element_type=jnp.float32) + b
    return y.reshape(shp[:-1] + (w.shape[0],))


def elu(v):
    return jnp.where(v > 0, v, jnp.exp(jnp.minimum(v, 0.0)) - 1.0)


def layer_norm(v, g, beta, eps=1e-5):
    mu = jnp.mean(v, axis=-1, keepdims=True)
    var = jnp.mean((v - mu) ** 2, axis=-1, keepdims=True)
    vn = (v - mu) * jax.lax.rsqrt(var + eps)
    shape = (1,) * (v.ndim - 1) + (-1,)
    return vn * g.reshape(shape) + beta.reshape(shape)


def mha(q_in, k_in, v_in, in_w, in_b, out_w, out_b, num_heads):
    E = q_in.shape[-1]
    dh = E // num_heads
    wq, wk, wv = in_w[:E], in_w[E:2 * E], in_w[2 * E:]
    bq, bk, bv = in_b[:, :E], in_b[:, E:2 * E], in_b[:, 2 * E:]
    q = linear(q_in, wq, bq)
    k = linear(k_in, wk, bk)
    v = linear(v_in, wv, bv)
    scale = 1.0 / jnp.sqrt(jnp.float32(dh))
    heads = []
    for h in range(num_heads):
        sl = slice(h * dh, (h + 1) * dh)
        qh, kh, vh = q[..., sl], k[..., sl], v[..., sl]
        s = jnp.einsum('bqd,bkd->bqk', qh, kh, precision=_HI,
                       preferred_element_type=jnp.float32) * scale
        s = s - jnp.max(s, axis=-1, keepdims=True)
        e = jnp.exp(s)
        pw = e / jnp.sum(e, axis=-1, keepdims=True)
        heads.append(jnp.einsum('bqk,bkd->bqd', pw, vh, precision=_HI,
                                preferred_element_type=jnp.float32))
    o = jnp.concatenate(heads, axis=-1)
    return linear(o, out_w, out_b)


def expert_forward(x, p):
    B = x.shape[0]
    F = p["in_proj_w"].shape[0]
    QN = p["query1"].shape[0]
    h = linear(x, p["in_proj_w"], p["in_proj_b"])
    kv = h.reshape(B, 1, F)
    q1 = jnp.broadcast_to(p["query1"][None], (B, QN, F))
    a = mha(q1, kv, kv, p["a1_in_w"], p["a1_in_b"],
            p["a1_out_w"], p["a1_out_b"], NUM_HEADS)
    a = layer_norm(a, p["ln1_1_g"], p["ln1_1_b"])
    m = linear(elu(linear(a, p["mlp1_w1"], p["mlp1_b1"])),
               p["mlp1_w2"], p["mlp1_b2"])
    a = layer_norm(a + m, p["ln1_2_g"], p["ln1_2_b"])
    t = mha(a, a, a, p["tb_in_w"], p["tb_in_b"],
            p["tb_out_w"], p["tb_out_b"], NUM_HEADS)
    a = layer_norm(a + t, p["tb_ln1_g"], p["tb_ln1_b"])
    m = linear(elu(linear(a, p["tb_mlp_w1"], p["tb_mlp_b1"])),
               p["tb_mlp_w2"], p["tb_mlp_b2"])
    a = layer_norm(a + m, p["tb_ln2_g"], p["tb_ln2_b"])
    q2 = jnp.broadcast_to(p["query2"][None], (B, 1, F))
    z = mha(q2, a, a, p["a2_in_w"], p["a2_in_b"],
            p["a2_out_w"], p["a2_out_b"], NUM_HEADS)
    z = layer_norm(z, p["ln2_1_g"], p["ln2_1_b"])
    m = linear(elu(linear(z, p["mlp2_w1"], p["mlp2_b1"])),
               p["mlp2_w2"], p["mlp2_b2"])
    z = layer_norm(z + m, p["ln2_2_g"], p["ln2_2_b"])
    y = linear(z, p["out_proj_w"], p["out_proj_b"])
    return y.reshape(B, -1)


def gating_forward(x, gp):
    h = elu(linear(x, gp["w1"], gp["b1"]))
    h = elu(linear(h, gp["w2"], gp["b2"]))
    logits = linear(h, gp["w3"], gp["b3"])
    logits = logits - jnp.max(logits, axis=-1, keepdims=True)
    e = jnp.exp(logits)
    return e / jnp.sum(e, axis=-1, keepdims=True)


def reference(x, gating_params, expert_params_list):
    if len(expert_params_list) == 1:
        return expert_forward(x, expert_params_list[0])
    gw = gating_forward(x, gating_params)
    outs = [gw[:, i:i + 1] * expert_forward(x, ep)
            for i, ep in enumerate(expert_params_list)]
    return jnp.sum(jnp.stack(outs), axis=0)


# ------------------------------ parameters -----------------------------------
def expert_param_shapes(in_dim, out_dim, f, qn):
    return [
        ("in_proj_w", (f, in_dim)), ("in_proj_b", (1, f)),
        ("query1", (qn, f)),
        ("a1_in_w", (3 * f, f)), ("a1_in_b", (1, 3 * f)),
        ("a1_out_w", (f, f)), ("a1_out_b", (1, f)),
        ("ln1_1_g", (1, f)), ("ln1_1_b", (1, f)),
        ("mlp1_w1", (4 * f, f)), ("mlp1_b1", (1, 4 * f)),
        ("mlp1_w2", (f, 4 * f)), ("mlp1_b2", (1, f)),
        ("ln1_2_g", (1, f)), ("ln1_2_b", (1, f)),
        ("tb_in_w", (3 * f, f)), ("tb_in_b", (1, 3 * f)),
        ("tb_out_w", (f, f)), ("tb_out_b", (1, f)),
        ("tb_ln1_g", (1, f)), ("tb_ln1_b", (1, f)),
        ("tb_mlp_w1", (4 * f, f)), ("tb_mlp_b1", (1, 4 * f)),
        ("tb_mlp_w2", (f, 4 * f)), ("tb_mlp_b2", (1, f)),
        ("tb_ln2_g", (1, f)), ("tb_ln2_b", (1, f)),
        ("a2_in_w", (3 * f, f)), ("a2_in_b", (1, 3 * f)),
        ("a2_out_w", (f, f)), ("a2_out_b", (1, f)),
        ("query2", (1, f)),
        ("ln2_1_g", (1, f)), ("ln2_1_b", (1, f)),
        ("mlp2_w1", (4 * f, f)), ("mlp2_b1", (1, 4 * f)),
        ("mlp2_w2", (f, 4 * f)), ("mlp2_b2", (1, f)),
        ("ln2_2_g", (1, f)), ("ln2_2_b", (1, f)),
        ("out_proj_w", (out_dim, f)), ("out_proj_b", (1, out_dim)),
    ]


EXPERT_PARAM_SHAPES = expert_param_shapes(IN_DIM, OUT_DIM, FEATURE_DIM, QUERY_NUM)

GATING_PARAM_SHAPES = [
    ("w1", (GATING_HIDDEN_SIZE, IN_DIM)), ("b1", (1, GATING_HIDDEN_SIZE)),
    ("w2", (GATING_HIDDEN_SIZE, GATING_HIDDEN_SIZE)), ("b2", (1, GATING_HIDDEN_SIZE)),
    ("w3", (EXPERT_NUM, GATING_HIDDEN_SIZE)), ("b3", (1, EXPERT_NUM)),
]


def init_params(key, shapes):
    params = {}
    for name, shape in shapes:
        key, sub = jax.random.split(key)
        if name.endswith("_g"):
            params[name] = jnp.ones(shape, jnp.float32)          # LayerNorm weight
        elif "ln" in name and name.endswith("_b"):
            params[name] = jnp.zeros(shape, jnp.float32)         # LayerNorm bias
        elif name.startswith("query"):
            params[name] = jax.random.normal(sub, shape, jnp.float32)
        elif name.endswith("_b") or name.startswith("b"):
            params[name] = 0.02 * jax.random.normal(sub, shape, jnp.float32)
        else:
            params[name] = 0.05 * jax.random.normal(sub, shape, jnp.float32)
    return params, key


# ----------------------------------- main ------------------------------------
if __name__ == "__main__":
    key = jax.random.PRNGKey(0)
    key, xk = jax.random.split(key)
    x = jax.random.normal(xk, (BATCH, IN_DIM), jnp.float32)

    gating_params, key = init_params(key, GATING_PARAM_SHAPES)
    expert_params_list = []
    for _ in range(EXPERT_NUM):
        ep, key = init_params(key, EXPERT_PARAM_SHAPES)
        expert_params_list.append(ep)

    packed = pack_params(gating_params, expert_params_list)
    forward = make_forward(EXPERT_NUM)

    y = jax.block_until_ready(forward(x, packed))
    assert y.shape == (BATCH, OUT_DIM), y.shape

    y_ref = jax.block_until_ready(reference(x, gating_params, expert_params_list))
    max_err = float(jnp.max(jnp.abs(y - y_ref)))
    # Tight enough to catch any slab-offset/packing/fusion bug (those are
    # O(0.1..1)); loose enough for MXU multi-pass reassociation noise between
    # the simplified kernel graph and the un-simplified reference graph.
    assert jnp.allclose(y, y_ref, rtol=1e-3, atol=1e-4), max_err

    print("KERNEL_OK")
</pallas_src>

<mosaic_0001>
module attributes {stable_mosaic.version = 11 : i64} {
  func.func @kernel(%arg0: memref<4x16xf32, #tpu.memory_space<vmem>>, %arg1: memref<66x32xf32, #tpu.memory_space<vmem>>, %arg2: memref<3x32xf32, #tpu.memory_space<vmem>>, %arg3: memref<128x16xf32, #tpu.memory_space<vmem>>, %arg4: memref<256x128xf32, #tpu.memory_space<vmem>>, %arg5: memref<768x256xf32, #tpu.memory_space<vmem>>, %arg6: memref<32x64xf32, #tpu.memory_space<vmem>>, %arg7: memref<19x128xf32, #tpu.memory_space<vmem>>, %arg8: memref<6x256xf32, #tpu.memory_space<vmem>>, %arg9: memref<4x12xf32, #tpu.memory_space<vmem>>) attributes {dimension_semantics = [], scalar_prefetch = 0 : i64, scratch_operands = 0 : i64, tpu.core_type = #tpu.core_type<tc>} {
    %c0 = arith.constant 0 : index
    %c0_0 = arith.constant 0 : index
    %0 = vector.load %arg0[%c0, %c0_0] : memref<4x16xf32, #tpu.memory_space<vmem>>, vector<4x16xf32>
    %c0_1 = arith.constant 0 : index
    %c0_2 = arith.constant 0 : index
    %1 = vector.load %arg1[%c0_1, %c0_2] : memref<66x32xf32, #tpu.memory_space<vmem>>, vector<32x16xf32>
    %cst = arith.constant dense<0.000000e+00> : vector<4x32xf32>
    %2 = tpu.matmul %0, %1, %cst {dimension_numbers = #tpu.dot_dimension_numbers<[1], [1], [0], [0], [0, 0, 1, 0], [], []>} : vector<4x16xf32>, vector<32x16xf32>, vector<4x32xf32> -> vector<4x32xf32>
    %c0_3 = arith.constant 0 : index
    %c0_4 = arith.constant 0 : index
    %3 = vector.load %arg2[%c0_3, %c0_4] : memref<3x32xf32, #tpu.memory_space<vmem>>, vector<1x32xf32>
    %4 = vector.broadcast %3 : vector<1x32xf32> to vector<4x32xf32>
    %5 = arith.addf %2, %4 : vector<4x32xf32>
    %cst_5 = arith.constant 0.000000e+00 : f32
    %6 = vector.broadcast %cst_5 : f32 to vector<4x32xf32>
    %7 = arith.cmpf ogt, %5, %6 : vector<4x32xf32>
    %cst_6 = arith.constant 0.000000e+00 : f32
    %8 = vector.broadcast %cst_6 : f32 to vector<4x32xf32>
    %9 = arith.minimumf %5, %8 : vector<4x32xf32>
    %10 = math.exp %9 : vector<4x32xf32>
    %cst_7 = arith.constant 1.000000e+00 : f32
    %11 = vector.broadcast %cst_7 : f32 to vector<4x32xf32>
    %12 = arith.subf %10, %11 : vector<4x32xf32>
    %13 = arith.select %7, %5, %12 : vector<4x32xi1>, vector<4x32xf32>
    %c32 = arith.constant 32 : index
    %c0_8 = arith.constant 0 : index
    %14 = vector.load %arg1[%c32, %c0_8] : memref<66x32xf32, #tpu.memory_space<vmem>>, vector<32x32xf32>
    %cst_9 = arith.constant dense<0.000000e+00> : vector<4x32xf32>
    %15 = tpu.matmul %13, %14, %cst_9 {dimension_numbers = #tpu.dot_dimension_numbers<[1], [1], [0], [0], [0, 0, 1, 0], [], []>} : vector<4x32xf32>, vector<32x32xf32>, vector<4x32xf32> -> vector<4x32xf32>
    %c1 = arith.constant 1 : index
    %c0_10 = arith.constant 0 : index
    %16 = vector.load %arg2[%c1, %c0_10] : memref<3x32xf32, #tpu.memory_space<vmem>>, vector<1x32xf32>
    %17 = vector.broadcast %16 : vector<1x32xf32> to vector<4x32xf32>
    %18 = arith.addf %15, %17 : vector<4x32xf32>
    %cst_11 = arith.constant 0.000000e+00 : f32
    %19 = vector.broadcast %cst_11 : f32 to vector<4x32xf32>
    %20 = arith.cmpf ogt, %18, %19 : vector<4x32xf32>
    %cst_12 = arith.constant 0.000000e+00 : f32
    %21 = vector.broadcast %cst_12 : f32 to vector<4x32xf32>
    %22 = arith.minimumf %18, %21 : vector<4x32xf32>
    %23 = math.exp %22 : vector<4x32xf32>
    %cst_13 = arith.constant 1.000000e+00 : f32
    %24 = vector.broadcast %cst_13 : f32 to vector<4x32xf32>
    %25 = arith.subf %23, %24 : vector<4x32xf32>
    %26 = arith.select %20, %18, %25 : vector<4x32xi1>, vector<4x32xf32>
    %c64 = arith.constant 64 : index
    %c0_14 = arith.constant 0 : index
    %27 = vector.load %arg1[%c64, %c0_14] : memref<66x32xf32, #tpu.memory_space<vmem>>, vector<2x32xf32>
    %cst_15 = arith.constant dense<0.000000e+00> : vector<4x2xf32>
    %28 = tpu.matmul %26, %27, %cst_15 {dimension_numbers = #tpu.dot_dimension_numbers<[1], [1], [0], [0], [0, 0, 1, 0], [], []>} : vector<4x32xf32>, vector<2x32xf32>, vector<4x2xf32> -> vector<4x2xf32>
    %c2 = arith.constant 2 : index
    %c0_16 = arith.constant 0 : index
    %29 = vector.load %arg2[%c2, %c0_16] : memref<3x32xf32, #tpu.memory_space<vmem>>, vector<1x2xf32>
    %30 = vector.broadcast %29 : vector<1x2xf32> to vector<4x2xf32>
    %31 = arith.addf %28, %30 : vector<4x2xf32>
    %cst_17 = arith.constant dense<0xFF800000> : vector<4xf32>
    %32 = vector.multi_reduction <maximumf>, %31, %cst_17 [1] : vector<4x2xf32> to vector<4xf32>
    %33 = vector.shape_cast %32 : vector<4xf32> to vector<4x1xf32>
    %34 = vector.broadcast %33 : vector<4x1xf32> to vector<4x2xf32>
    %35 = arith.subf %31, %34 : vector<4x2xf32>
    %36 = math.exp %35 : vector<4x2xf32>
    %cst_18 = arith.constant dense<0.000000e+00> : vector<4xf32>
    %37 = vector.multi_reduction <add>, %36, %cst_18 [1] : vector<4x2xf32> to vector<4xf32>
    %38 = vector.shape_cast %37 : vector<4xf32> to vector<4x1xf32>
    %39 = vector.broadcast %38 : vector<4x1xf32> to vector<4x2xf32>
    %40 = arith.divf %36, %39 : vector<4x2xf32>
    %c0_19 = arith.constant 0 : index
    %c0_20 = arith.constant 0 : index
    %41 = vector.load %arg3[%c0_19, %c0_20] : memref<128x16xf32, #tpu.memory_space<vmem>>, vector<128x16xf32>
    %cst_21 = arith.constant dense<0.000000e+00> : vector<4x128xf32>
    %42 = tpu.matmul %0, %41, %cst_21 {dimension_numbers = #tpu.dot_dimension_numbers<[1], [1], [0], [0], [0, 0, 1, 0], [], []>} : vector<4x16xf32>, vector<128x16xf32>, vector<4x128xf32> -> vector<4x128xf32>
    %c0_22 = arith.constant 0 : index
    %c0_23 = arith.constant 0 : index
    %43 = vector.load %arg7[%c0_22, %c0_23] : memref<19x128xf32, #tpu.memory_space<vmem>>, vector<1x128xf32>
    %44 = vector.broadcast %43 : vector<1x128xf32> to vector<4x128xf32>
    %45 = arith.addf %42, %44 : vector<4x128xf32>
    %46 = vector.extract_strided_slice %45 {offsets = [0, 0], sizes = [4, 64], strides = [1, 1]} : vector<4x128xf32> to vector<4x64xf32>
    %cst_24 = arith.constant dense<0.000000e+00> : vector<4xf32>
    %47 = vector.multi_reduction <add>, %46, %cst_24 [1] : vector<4x64xf32> to vector<4xf32>
    %48 = vector.shape_cast %47 : vector<4xf32> to vector<4x1xf32>
    %cst_25 = arith.constant 6.400000e+01 : f32
    %49 = vector.broadcast %cst_25 : f32 to vector<4x1xf32>
    %50 = arith.divf %48, %49 : vector<4x1xf32>
    %51 = vector.broadcast %50 : vector<4x1xf32> to vector<4x64xf32>
    %52 = arith.subf %46, %51 : vector<4x64xf32>
    %53 = arith.mulf %52, %52 : vector<4x64xf32>
    %cst_26 = arith.constant dense<0.000000e+00> : vector<4xf32>
    %54 = vector.multi_reduction <add>, %53, %cst_26 [1] : vector<4x64xf32> to vector<4xf32>
    %55 = vector.shape_cast %54 : vector<4xf32> to vector<4x1xf32>
    %cst_27 = arith.constant 6.400000e+01 : f32
    %56 = vector.broadcast %cst_27 : f32 to vector<4x1xf32>
    %57 = arith.divf %55, %56 : vector<4x1xf32>
    %58 = vector.broadcast %50 : vector<4x1xf32> to vector<4x64xf32>
    %59 = arith.subf %46, %58 : vector<4x64xf32>
    %cst_28 = arith.constant 9.99999974E-6 : f32
    %60 = vector.broadcast %cst_28 : f32 to vector<4x1xf32>
    %61 = arith.addf %57, %60 : vector<4x1xf32>
    %62 = math.rsqrt %61 : vector<4x1xf32>
    %63 = vector.broadcast %62 : vector<4x1xf32> to vector<4x64xf32>
    %64 = arith.mulf %59, %63 : vector<4x64xf32>
    %65 = vector.extract_strided_slice %45 {offsets = [0, 64], sizes = [4, 64], strides = [1, 1]} : vector<4x128xf32> to vector<4x64xf32>
    %cst_29 = arith.constant dense<0.000000e+00> : vector<4xf32>
    %66 = vector.multi_reduction <add>, %65, %cst_29 [1] : vector<4x64xf32> to vector<4xf32>
    %67 = vector.shape_cast %66 : vector<4xf32> to vector<4x1xf32>
    %cst_30 = arith.constant 6.400000e+01 : f32
    %68 = vector.broadcast %cst_30 : f32 to vector<4x1xf32>
    %69 = arith.divf %67, %68 : vector<4x1xf32>
    %70 = vector.broadcast %69 : vector<4x1xf32> to vector<4x64xf32>
    %71 = arith.subf %65, %70 : vector<4x64xf32>
    %72 = arith.mulf %71, %71 : vector<4x64xf32>
    %cst_31 = arith.constant dense<0.000000e+00> : vector<4xf32>
    %73 = vector.multi_reduction <add>, %72, %cst_31 [1] : vector<4x64xf32> to vector<4xf32>
    %74 = vector.shape_cast %73 : vector<4xf32> to vector<4x1xf32>
    %cst_32 = arith.constant 6.400000e+01 : f32
    %75 = vector.broadcast %cst_32 : f32 to vector<4x1xf32>
    %76 = arith.divf %74, %75 : vector<4x1xf32>
    %77 = vector.broadcast %69 : vector<4x1xf32> to vector<4x64xf32>
    %78 = arith.subf %65, %77 : vector<4x64xf32>
    %cst_33 = arith.constant 9.99999974E-6 : f32
    %79 = vector.broadcast %cst_33 : f32 to vector<4x1xf32>
    %80 = arith.addf %76, %79 : vector<4x1xf32>
    %81 = math.rsqrt %80 : vector<4x1xf32>
    %82 = vector.broadcast %81 : vector<4x1xf32> to vector<4x64xf32>
    %83 = arith.mulf %78, %82 : vector<4x64xf32>
    %84 = tpu.concatenate %64, %83 in 1 : vector<4x64xf32>, vector<4x64xf32> -> vector<4x128xf32>
    %c1_34 = arith.constant 1 : index
    %c0_35 = arith.constant 0 : index
    %85 = vector.load %arg7[%c1_34, %c0_35] : memref<19x128xf32, #tpu.memory_space<vmem>>, vector<1x128xf32>
    %86 = vector.broadcast %85 : vector<1x128xf32> to vector<4x128xf32>
    %87 = arith.mulf %84, %86 : vector<4x128xf32>
    %c2_36 = arith.constant 2 : index
    %c0_37 = arith.constant 0 : index
    %88 = vector.load %arg7[%c2_36, %c0_37] : memref<19x128xf32, #tpu.memory_space<vmem>>, vector<1x128xf32>
    %89 = vector.broadcast %88 : vector<1x128xf32> to vector<4x128xf32>
    %90 = arith.addf %87, %89 : vector<4x128xf32>
    %91 = vector.extract_strided_slice %90 {offsets = [0, 0], sizes = [4, 64], strides = [1, 1]} : vector<4x128xf32> to vector<4x64xf32>
    %c0_38 = arith.constant 0 : index
    %c0_39 = arith.constant 0 : index
    %92 = vector.load %arg5[%c0_38, %c0_39] : memref<768x256xf32, #tpu.memory_space<vmem>>, vector<64x256xf32>
    %c64_40 = arith.constant 64 : index
    %c0_41 = arith.constant 0 : index
    %93 = vector.load %arg5[%c64_40, %c0_41] : memref<768x256xf32, #tpu.memory_space<vmem>>, vector<64x256xf32>
    %c0_42 = arith.constant 0 : index
    %c0_43 = arith.constant 0 : index
    %94 = vector.load %arg8[%c0_42, %c0_43] : memref<6x256xf32, #tpu.memory_space<vmem>>, vector<1x256xf32>
    %cst_44 = arith.constant dense<0.000000e+00> : vector<4x256xf32>
    %95 = tpu.matmul %91, %92, %cst_44 {dimension_numbers = #tpu.dot_dimension_numbers<[1], [0], [0], [1], [0, 0, 1, 1], [], []>} : vector<4x64xf32>, vector<64x256xf32>, vector<4x256xf32> -> vector<4x256xf32>
    %96 = vector.broadcast %94 : vector<1x256xf32> to vector<4x256xf32>
    %97 = arith.addf %95, %96 : vector<4x256xf32>
    %cst_45 = arith.constant 0.000000e+00 : f32
    %98 = vector.broadcast %cst_45 : f32 to vector<4x256xf32>
    %99 = arith.cmpf ogt, %97, %98 : vector<4x256xf32>
    %cst_46 = arith.constant 0.000000e+00 : f32
    %100 = vector.broadcast %cst_46 : f32 to vector<4x256xf32>
    %101 = arith.minimumf %97, %100 : vector<4x256xf32>
    %102 = math.exp %101 : vector<4x256xf32>
    %cst_47 = arith.constant 1.000000e+00 : f32
    %103 = vector.broadcast %cst_47 : f32 to vector<4x256xf32>
    %104 = arith.subf %102, %103 : vector<4x256xf32>
    %105 = arith.select %99, %97, %104 : vector<4x256xi1>, vector<4x256xf32>
    %cst_48 = arith.constant dense<0.000000e+00> : vector<4x64xf32>
    %106 = tpu.matmul %105, %93, %cst_48 {dimension_numbers = #tpu.dot_dimension_numbers<[1], [1], [0], [0], [0, 0, 1, 0], [], []>} : vector<4x256xf32>, vector<64x256xf32>, vector<4x64xf32> -> vector<4x64xf32>
    %107 = vector.extract_strided_slice %90 {offsets = [0, 64], sizes = [4, 64], strides = [1, 1]} : vector<4x128xf32> to vector<4x64xf32>
    %c384 = arith.constant 384 : index
    %c0_49 = arith.constant 0 : index
    %108 = vector.load %arg5[%c384, %c0_49] : memref<768x256xf32, #tpu.memory_space<vmem>>, vector<64x256xf32>
    %c448 = arith.constant 448 : index
    %c0_50 = arith.constant 0 : index
    %109 = vector.load %arg5[%c448, %c0_50] : memref<768x256xf32, #tpu.memory_space<vmem>>, vector<64x256xf32>
    %c3 = arith.constant 3 : index
    %c0_51 = arith.constant 0 : index
    %110 = vector.load %arg8[%c3, %c0_51] : memref<6x256xf32, #tpu.memory_space<vmem>>, vector<1x256xf32>
    %cst_52 = arith.constant dense<0.000000e+00> : vector<4x256xf32>
    %111 = tpu.matmul %107, %108, %cst_52 {dimension_numbers = #tpu.dot_dimension_numbers<[1], [0], [0], [1], [0, 0, 1, 1], [], []>} : vector<4x64xf32>, vector<64x256xf32>, vector<4x256xf32> -> vector<4x256xf32>
    %112 = vector.broadcast %110 : vector<1x256xf32> to vector<4x256xf32>
    %113 = arith.addf %111, %112 : vector<4x256xf32>
    %cst_53 = arith.constant 0.000000e+00 : f32
    %114 = vector.broadcast %cst_53 : f32 to vector<4x256xf32>
    %115 = arith.cmpf ogt, %113, %114 : vector<4x256xf32>
    %cst_54 = arith.constant 0.000000e+00 : f32
    %116 = vector.broadcast %cst_54 : f32 to vector<4x256xf32>
    %117 = arith.minimumf %113, %116 : vector<4x256xf32>
    %118 = math.exp %117 : vector<4x256xf32>
    %cst_55 = arith.constant 1.000000e+00 : f32
    %119 = vector.broadcast %cst_55 : f32 to vector<4x256xf32>
    %120 = arith.subf %118, %119 : vector<4x256xf32>
    %121 = arith.select %115, %113, %120 : vector<4x256xi1>, vector<4x256xf32>
    %cst_56 = arith.constant dense<0.000000e+00> : vector<4x64xf32>
    %122 = tpu.matmul %121, %109, %cst_56 {dimension_numbers = #tpu.dot_dimension_numbers<[1], [1], [0], [0], [0, 0, 1, 0], [], []>} : vector<4x256xf32>, vector<64x256xf32>, vector<4x64xf32> -> vector<4x64xf32>
    %123 = tpu.concatenate %106, %122 in 1 : vector<4x64xf32>, vector<4x64xf32> -> vector<4x128xf32>
    %c3_57 = arith.constant 3 : index
    %c0_58 = arith.constant 0 : index
    %124 = vector.load %arg7[%c3_57, %c0_58] : memref<19x128xf32, #tpu.memory_space<vmem>>, vector<1x128xf32>
    %125 = vector.broadcast %124 : vector<1x128xf32> to vector<4x128xf32>
    %126 = arith.addf %123, %125 : vector<4x128xf32>
    %127 = arith.addf %90, %126 : vector<4x128xf32>
    %128 = vector.extract_strided_slice %127 {offsets = [0, 0], sizes = [4, 64], strides = [1, 1]} : vector<4x128xf32> to vector<4x64xf32>
    %cst_59 = arith.constant dense<0.000000e+00> : vector<4xf32>
    %129 = vector.multi_reduction <add>, %128, %cst_59 [1] : vector<4x64xf32> to vector<4xf32>
    %130 = vector.shape_cast %129 : vector<4xf32> to vector<4x1xf32>
    %cst_60 = arith.constant 6.400000e+01 : f32
    %131 = vector.broadcast %cst_60 : f32 to vector<4x1xf32>
    %132 = arith.divf %130, %131 : vector<4x1xf32>
    %133 = vector.broadcast %132 : vector<4x1xf32> to vector<4x64xf32>
    %134 = arith.subf %128, %133 : vector<4x64xf32>
    %135 = arith.mulf %134, %134 : vector<4x64xf32>
    %cst_61 = arith.constant dense<0.000000e+00> : vector<4xf32>
    %136 = vector.multi_reduction <add>, %135, %cst_61 [1] : vector<4x64xf32> to vector<4xf32>
    %137 = vector.shape_cast %136 : vector<4xf32> to vector<4x1xf32>
    %cst_62 = arith.constant 6.400000e+01 : f32
    %138 = vector.broadcast %cst_62 : f32 to vector<4x1xf32>
    %139 = arith.divf %137, %138 : vector<4x1xf32>
    %140 = vector.broadcast %132 : vector<4x1xf32> to vector<4x64xf32>
    %141 = arith.subf %128, %140 : vector<4x64xf32>
    %cst_63 = arith.constant 9.99999974E-6 : f32
    %142 = vector.broadcast %cst_63 : f32 to vector<4x1xf32>
    %143 = arith.addf %139, %142 : vector<4x1xf32>
    %144 = math.rsqrt %143 : vector<4x1xf32>
    %145 = vector.broadcast %144 : vector<4x1xf32> to vector<4x64xf32>
    %146 = arith.mulf %141, %145 : vector<4x64xf32>
    %147 = vector.extract_strided_slice %127 {offsets = [0, 64], sizes = [4, 64], strides = [1, 1]} : vector<4x128xf32> to vector<4x64xf32>
    %cst_64 = arith.constant dense<0.000000e+00> : vector<4xf32>
    %148 = vector.multi_reduction <add>, %147, %cst_64 [1] : vector<4x64xf32> to vector<4xf32>
    %149 = vector.shape_cast %148 : vector<4xf32> to vector<4x1xf32>
    %cst_65 = arith.constant 6.400000e+01 : f32
    %150 = vector.broadcast %cst_65 : f32 to vector<4x1xf32>
    %151 = arith.divf %149, %150 : vector<4x1xf32>
    %152 = vector.broadcast %151 : vector<4x1xf32> to vector<4x64xf32>
    %153 = arith.subf %147, %152 : vector<4x64xf32>
    %154 = arith.mulf %153, %153 : vector<4x64xf32>
    %cst_66 = arith.constant dense<0.000000e+00> : vector<4xf32>
    %155 = vector.multi_reduction <add>, %154, %cst_66 [1] : vector<4x64xf32> to vector<4xf32>
    %156 = vector.shape_cast %155 : vector<4xf32> to vector<4x1xf32>
    %cst_67 = arith.constant 6.400000e+01 : f32
    %157 = vector.broadcast %cst_67 : f32 to vector<4x1xf32>
    %158 = arith.divf %156, %157 : vector<4x1xf32>
    %159 = vector.broadcast %151 : vector<4x1xf32> to vector<4x64xf32>
    %160 = arith.subf %147, %159 : vector<4x64xf32>
    %cst_68 = arith.constant 9.99999974E-6 : f32
    %161 = vector.broadcast %cst_68 : f32 to vector<4x1xf32>
    %162 = arith.addf %158, %161 : vector<4x1xf32>
    %163 = math.rsqrt %162 : vector<4x1xf32>
    %164 = vector.broadcast %163 : vector<4x1xf32> to vector<4x64xf32>
    %165 = arith.mulf %160, %164 : vector<4x64xf32>
    %166 = tpu.concatenate %146, %165 in 1 : vector<4x64xf32>, vector<4x64xf32> -> vector<4x128xf32>
    %c4 = arith.constant 4 : index
    %c0_69 = arith.constant 0 : index
    %167 = vector.load %arg7[%c4, %c0_69] : memref<19x128xf32, #tpu.memory_space<vmem>>, vector<1x128xf32>
    %168 = vector.broadcast %167 : vector<1x128xf32> to vector<4x128xf32>
    %169 = arith.mulf %166, %168 : vector<4x128xf32>
    %c5 = arith.constant 5 : index
    %c0_70 = arith.constant 0 : index
    %170 = vector.load %arg7[%c5, %c0_70] : memref<19x128xf32, #tpu.memory_space<vmem>>, vector<1x128xf32>
    %171 = vector.broadcast %170 : vector<1x128xf32> to vector<4x128xf32>
    %172 = arith.addf %169, %171 : vector<4x128xf32>
    %c0_71 = arith.constant 0 : index
    %c0_72 = arith.constant 0 : index
    %173 = vector.load %arg4[%c0_71, %c0_72] : memref<256x128xf32, #tpu.memory_space<vmem>>, vector<128x128xf32>
    %cst_73 = arith.constant dense<0.000000e+00> : vector<4x128xf32>
    %174 = tpu.matmul %172, %173, %cst_73 {dimension_numbers = #tpu.dot_dimension_numbers<[1], [0], [0], [1], [0, 0, 1, 1], [], []>} : vector<4x128xf32>, vector<128x128xf32>, vector<4x128xf32> -> vector<4x128xf32>
    %c6 = arith.constant 6 : index
    %c0_74 = arith.constant 0 : index
    %175 = vector.load %arg7[%c6, %c0_74] : memref<19x128xf32, #tpu.memory_space<vmem>>, vector<1x128xf32>
    %176 = vector.broadcast %175 : vector<1x128xf32> to vector<4x128xf32>
    %177 = arith.addf %174, %176 : vector<4x128xf32>
    %178 = arith.addf %172, %177 : vector<4x128xf32>
    %179 = vector.extract_strided_slice %178 {offsets = [0, 0], sizes = [4, 64], strides = [1, 1]} : vector<4x128xf32> to vector<4x64xf32>
    %cst_75 = arith.constant dense<0.000000e+00> : vector<4xf32>
    %180 = vector.multi_reduction <add>, %179, %cst_75 [1] : vector<4x64xf32> to vector<4xf32>
    %181 = vector.shape_cast %180 : vector<4xf32> to vector<4x1xf32>
    %cst_76 = arith.constant 6.400000e+01 : f32
    %182 = vector.broadcast %cst_76 : f32 to vector<4x1xf32>
    %183 = arith.divf %181, %182 : vector<4x1xf32>
    %184 = vector.broadcast %183 : vector<4x1xf32> to vector<4x64xf32>
    %185 = arith.subf %179, %184 : vector<4x64xf32>
    %186 = arith.mulf %185, %185 : vector<4x64xf32>
    %cst_77 = arith.constant dense<0.000000e+00> : vector<4xf32>
    %187 = vector.multi_reduction <add>, %186, %cst_77 [1] : vector<4x64xf32> to vector<4xf32>
    %188 = vector.shape_cast %187 : vector<4xf32> to vector<4x1xf32>
    %cst_78 = arith.constant 6.400000e+01 : f32
    %189 = vector.broadcast %cst_78 : f32 to vector<4x1xf32>
    %190 = arith.divf %188, %189 : vector<4x1xf32>
    %191 = vector.broadcast %183 : vector<4x1xf32> to vector<4x64xf32>
    %192 = arith.subf %179, %191 : vector<4x64xf32>
    %cst_79 = arith.constant 9.99999974E-6 : f32
    %193 = vector.broadcast %cst_79 : f32 to vector<4x1xf32>
    %194 = arith.addf %190, %193 : vector<4x1xf32>
    %195 = math.rsqrt %194 : vector<4x1xf32>
    %196 = vector.broadcast %195 : vector<4x1xf32> to vector<4x64xf32>
    %197 = arith.mulf %192, %196 : vector<4x64xf32>
    %198 = vector.extract_strided_slice %178 {offsets = [0, 64], sizes = [4, 64], strides = [1, 1]} : vector<4x128xf32> to vector<4x64xf32>
    %cst_80 = arith.constant dense<0.000000e+00> : vector<4xf32>
    %199 = vector.multi_reduction <add>, %198, %cst_80 [1] : vector<4x64xf32> to vector<4xf32>
    %200 = vector.shape_cast %199 : vector<4xf32> to vector<4x1xf32>
    %cst_81 = arith.constant 6.400000e+01 : f32
    %201 = vector.broadcast %cst_81 : f32 to vector<4x1xf32>
    %202 = arith.divf %200, %201 : vector<4x1xf32>
    %203 = vector.broadcast %202 : vector<4x1xf32> to vector<4x64xf32>
    %204 = arith.subf %198, %203 : vector<4x64xf32>
    %205 = arith.mulf %204, %204 : vector<4x64xf32>
    %cst_82 = arith.constant dense<0.000000e+00> : vector<4xf32>
    %206 = vector.multi_reduction <add>, %205, %cst_82 [1] : vector<4x64xf32> to vector<4xf32>
    %207 = vector.shape_cast %206 : vector<4xf32> to vector<4x1xf32>
    %cst_83 = arith.constant 6.400000e+01 : f32
    %208 = vector.broadcast %cst_83 : f32 to vector<4x1xf32>
    %209 = arith.divf %207, %208 : vector<4x1xf32>
    %210 = vector.broadcast %202 : vector<4x1xf32> to vector<4x64xf32>
    %211 = arith.subf %198, %210 : vector<4x64xf32>
    %cst_84 = arith.constant 9.99999974E-6 : f32
    %212 = vector.broadcast %cst_84 : f32 to vector<4x1xf32>
    %213 = arith.addf %209, %212 : vector<4x1xf32>
    %214 = math.rsqrt %213 : vector<4x1xf32>
    %215 = vector.broadcast %214 : vector<4x1xf32> to vector<4x64xf32>
    %216 = arith.mulf %211, %215 : vector<4x64xf32>
    %217 = tpu.concatenate %197, %216 in 1 : vector<4x64xf32>, vector<4x64xf32> -> vector<4x128xf32>
    %c7 = arith.constant 7 : index
    %c0_85 = arith.constant 0 : index
    %218 = vector.load %arg7[%c7, %c0_85] : memref<19x128xf32, #tpu.memory_space<vmem>>, vector<1x128xf32>
    %219 = vector.broadcast %218 : vector<1x128xf32> to vector<4x128xf32>
    %220 = arith.mulf %217, %219 : vector<4x128xf32>
    %c8 = arith.constant 8 : index
    %c0_86 = arith.constant 0 : index
    %221 = vector.load %arg7[%c8, %c0_86] : memref<19x128xf32, #tpu.memory_space<vmem>>, vector<1x128xf32>
    %222 = vector.broadcast %221 : vector<1x128xf32> to vector<4x128xf32>
    %223 = arith.addf %220, %222 : vector<4x128xf32>
    %224 = vector.extract_strided_slice %223 {offsets = [0, 0], sizes = [4, 64], strides = [1, 1]} : vector<4x128xf32> to vector<4x64xf32>
    %c128 = arith.constant 128 : index
    %c0_87 = arith.constant 0 : index
    %225 = vector.load %arg5[%c128, %c0_87] : memref<768x256xf32, #tpu.memory_space<vmem>>, vector<64x256xf32>
    %c192 = arith.constant 192 : index
    %c0_88 = arith.constant 0 : index
    %226 = vector.load %arg5[%c192, %c0_88] : memref<768x256xf32, #tpu.memory_space<vmem>>, vector<64x256xf32>
    %c1_89 = arith.constant 1 : index
    %c0_90 = arith.constant 0 : index
    %227 = vector.load %arg8[%c1_89, %c0_90] : memref<6x256xf32, #tpu.memory_space<vmem>>, vector<1x256xf32>
    %cst_91 = arith.constant dense<0.000000e+00> : vector<4x256xf32>
    %228 = tpu.matmul %224, %225, %cst_91 {dimension_numbers = #tpu.dot_dimension_numbers<[1], [0], [0], [1], [0, 0, 1, 1], [], []>} : vector<4x64xf32>, vector<64x256xf32>, vector<4x256xf32> -> vector<4x256xf32>
    %229 = vector.broadcast %227 : vector<1x256xf32> to vector<4x256xf32>
    %230 = arith.addf %228, %229 : vector<4x256xf32>
    %cst_92 = arith.constant 0.000000e+00 : f32
    %231 = vector.broadcast %cst_92 : f32 to vector<4x256xf32>
    %232 = arith.cmpf ogt, %230, %231 : vector<4x256xf32>
    %cst_93 = arith.constant 0.000000e+00 : f32
    %233 = vector.broadcast %cst_93 : f32 to vector<4x256xf32>
    %234 = arith.minimumf %230, %233 : vector<4x256xf32>
    %235 = math.exp %234 : vector<4x256xf32>
    %cst_94 = arith.constant 1.000000e+00 : f32
    %236 = vector.broadcast %cst_94 : f32 to vector<4x256xf32>
    %237 = arith.subf %235, %236 : vector<4x256xf32>
    %238 = arith.select %232, %230, %237 : vector<4x256xi1>, vector<4x256xf32>
    %cst_95 = arith.constant dense<0.000000e+00> : vector<4x64xf32>
    %239 = tpu.matmul %238, %226, %cst_95 {dimension_numbers = #tpu.dot_dimension_numbers<[1], [1], [0], [0], [0, 0, 1, 0], [], []>} : vector<4x256xf32>, vector<64x256xf32>, vector<4x64xf32> -> vector<4x64xf32>
    %240 = vector.extract_strided_slice %223 {offsets = [0, 64], sizes = [4, 64], strides = [1, 1]} : vector<4x128xf32> to vector<4x64xf32>
    %c512 = arith.constant 512 : index
    %c0_96 = arith.constant 0 : index
    %241 = vector.load %arg5[%c512, %c0_96] : memref<768x256xf32, #tpu.memory_space<vmem>>, vector<64x256xf32>
    %c576 = arith.constant 576 : index
    %c0_97 = arith.constant 0 : index
    %242 = vector.load %arg5[%c576, %c0_97] : memref<768x256xf32, #tpu.memory_space<vmem>>, vector<64x256xf32>
    %c4_98 = arith.constant 4 : index
    %c0_99 = arith.constant 0 : index
    %243 = vector.load %arg8[%c4_98, %c0_99] : memref<6x256xf32, #tpu.memory_space<vmem>>, vector<1x256xf32>
    %cst_100 = arith.constant dense<0.000000e+00> : vector<4x256xf32>
    %244 = tpu.matmul %240, %241, %cst_100 {dimension_numbers = #tpu.dot_dimension_numbers<[1], [0], [0], [1], [0, 0, 1, 1], [], []>} : vector<4x64xf32>, vector<64x256xf32>, vector<4x256xf32> -> vector<4x256xf32>
    %245 = vector.broadcast %243 : vector<1x256xf32> to vector<4x256xf32>
    %246 = arith.addf %244, %245 : vector<4x256xf32>
    %cst_101 = arith.constant 0.000000e+00 : f32
    %247 = vector.broadcast %cst_101 : f32 to vector<4x256xf32>
    %248 = arith.cmpf ogt, %246, %247 : vector<4x256xf32>
    %cst_102 = arith.constant 0.000000e+00 : f32
    %249 = vector.broadcast %cst_102 : f32 to vector<4x256xf32>
    %250 = arith.minimumf %246, %249 : vector<4x256xf32>
    %251 = math.exp %250 : vector<4x256xf32>
    %cst_103 = arith.constant 1.000000e+00 : f32
    %252 = vector.broadcast %cst_103 : f32 to vector<4x256xf32>
    %253 = arith.subf %251, %252 : vector<4x256xf32>
    %254 = arith.select %248, %246, %253 : vector<4x256xi1>, vector<4x256xf32>
    %cst_104 = arith.constant dense<0.000000e+00> : vector<4x64xf32>
    %255 = tpu.matmul %254, %242, %cst_104 {dimension_numbers = #tpu.dot_dimension_numbers<[1], [1], [0], [0], [0, 0, 1, 0], [], []>} : vector<4x256xf32>, vector<64x256xf32>, vector<4x64xf32> -> vector<4x64xf32>
    %256 = tpu.concatenate %239, %255 in 1 : vector<4x64xf32>, vector<4x64xf32> -> vector<4x128xf32>
    %c9 = arith.constant 9 : index
    %c0_105 = arith.constant 0 : index
    %257 = vector.load %arg7[%c9, %c0_105] : memref<19x128xf32, #tpu.memory_space<vmem>>, vector<1x128xf32>
    %258 = vector.broadcast %257 : vector<1x128xf32> to vector<4x128xf32>
    %259 = arith.addf %256, %258 : vector<4x128xf32>
    %260 = arith.addf %223, %259 : vector<4x128xf32>
    %261 = vector.extract_strided_slice %260 {offsets = [0, 0], sizes = [4, 64], strides = [1, 1]} : vector<4x128xf32> to vector<4x64xf32>
    %cst_106 = arith.constant dense<0.000000e+00> : vector<4xf32>
    %262 = vector.multi_reduction <add>, %261, %cst_106 [1] : vector<4x64xf32> to vector<4xf32>
    %263 = vector.shape_cast %262 : vector<4xf32> to vector<4x1xf32>
    %cst_107 = arith.constant 6.400000e+01 : f32
    %264 = vector.broadcast %cst_107 : f32 to vector<4x1xf32>
    %265 = arith.divf %263, %264 : vector<4x1xf32>
    %266 = vector.broadcast %265 : vector<4x1xf32> to vector<4x64xf32>
    %267 = arith.subf %261, %266 : vector<4x64xf32>
    %268 = arith.mulf %267, %267 : vector<4x64xf32>
    %cst_108 = arith.constant dense<0.000000e+00> : vector<4xf32>
    %269 = vector.multi_reduction <add>, %268, %cst_108 [1] : vector<4x64xf32> to vector<4xf32>
    %270 = vector.shape_cast %269 : vector<4xf32> to vector<4x1xf32>
    %cst_109 = arith.constant 6.400000e+01 : f32
    %271 = vector.broadcast %cst_109 : f32 to vector<4x1xf32>
    %272 = arith.divf %270, %271 : vector<4x1xf32>
    %273 = vector.broadcast %265 : vector<4x1xf32> to vector<4x64xf32>
    %274 = arith.subf %261, %273 : vector<4x64xf32>
    %cst_110 = arith.constant 9.99999974E-6 : f32
    %275 = vector.broadcast %cst_110 : f32 to vector<4x1xf32>
    %276 = arith.addf %272, %275 : vector<4x1xf32>
    %277 = math.rsqrt %276 : vector<4x1xf32>
    %278 = vector.broadcast %277 : vector<4x1xf32> to vector<4x64xf32>
    %279 = arith.mulf %274, %278 : vector<4x64xf32>
    %280 = vector.extract_strided_slice %260 {offsets = [0, 64], sizes = [4, 64], strides = [1, 1]} : vector<4x128xf32> to vector<4x64xf32>
    %cst_111 = arith.constant dense<0.000000e+00> : vector<4xf32>
    %281 = vector.multi_reduction <add>, %280, %cst_111 [1] : vector<4x64xf32> to vector<4xf32>
    %282 = vector.shape_cast %281 : vector<4xf32> to vector<4x1xf32>
    %cst_112 = arith.constant 6.400000e+01 : f32
    %283 = vector.broadcast %cst_112 : f32 to vector<4x1xf32>
    %284 = arith.divf %282, %283 : vector<4x1xf32>
    %285 = vector.broadcast %284 : vector<4x1xf32> to vector<4x64xf32>
    %286 = arith.subf %280, %285 : vector<4x64xf32>
    %287 = arith.mulf %286, %286 : vector<4x64xf32>
    %cst_113 = arith.constant dense<0.000000e+00> : vector<4xf32>
    %288 = vector.multi_reduction <add>, %287, %cst_113 [1] : vector<4x64xf32> to vector<4xf32>
    %289 = vector.shape_cast %288 : vector<4xf32> to vector<4x1xf32>
    %cst_114 = arith.constant 6.400000e+01 : f32
    %290 = vector.broadcast %cst_114 : f32 to vector<4x1xf32>
    %291 = arith.divf %289, %290 : vector<4x1xf32>
    %292 = vector.broadcast %284 : vector<4x1xf32> to vector<4x64xf32>
    %293 = arith.subf %280, %292 : vector<4x64xf32>
    %cst_115 = arith.constant 9.99999974E-6 : f32
    %294 = vector.broadcast %cst_115 : f32 to vector<4x1xf32>
    %295 = arith.addf %291, %294 : vector<4x1xf32>
    %296 = math.rsqrt %295 : vector<4x1xf32>
    %297 = vector.broadcast %296 : vector<4x1xf32> to vector<4x64xf32>
    %298 = arith.mulf %293, %297 : vector<4x64xf32>
    %299 = tpu.concatenate %279, %298 in 1 : vector<4x64xf32>, vector<4x64xf32> -> vector<4x128xf32>
    %c10 = arith.constant 10 : index
    %c0_116 = arith.constant 0 : index
    %300 = vector.load %arg7[%c10, %c0_116] : memref<19x128xf32, #tpu.memory_space<vmem>>, vector<1x128xf32>
    %301 = vector.broadcast %300 : vector<1x128xf32> to vector<4x128xf32>
    %302 = arith.mulf %299, %301 : vector<4x128xf32>
    %c11 = arith.constant 11 : index
    %c0_117 = arith.constant 0 : index
    %303 = vector.load %arg7[%c11, %c0_117] : memref<19x128xf32, #tpu.memory_space<vmem>>, vector<1x128xf32>
    %304 = vector.broadcast %303 : vector<1x128xf32> to vector<4x128xf32>
    %305 = arith.addf %302, %304 : vector<4x128xf32>
    %c128_118 = arith.constant 128 : index
    %c0_119 = arith.constant 0 : index
    %306 = vector.load %arg4[%c128_118, %c0_119] : memref<256x128xf32, #tpu.memory_space<vmem>>, vector<128x128xf32>
    %cst_120 = arith.constant dense<0.000000e+00> : vector<4x128xf32>
    %307 = tpu.matmul %305, %306, %cst_120 {dimension_numbers = #tpu.dot_dimension_numbers<[1], [0], [0], [1], [0, 0, 1, 1], [], []>} : vector<4x128xf32>, vector<128x128xf32>, vector<4x128xf32> -> vector<4x128xf32>
    %c12 = arith.constant 12 : index
    %c0_121 = arith.constant 0 : index
    %308 = vector.load %arg7[%c12, %c0_121] : memref<19x128xf32, #tpu.memory_space<vmem>>, vector<1x128xf32>
    %309 = vector.broadcast %308 : vector<1x128xf32> to vector<4x128xf32>
    %310 = arith.addf %307, %309 : vector<4x128xf32>
    %311 = vector.extract_strided_slice %310 {offsets = [0, 0], sizes = [4, 64], strides = [1, 1]} : vector<4x128xf32> to vector<4x64xf32>
    %cst_122 = arith.constant dense<0.000000e+00> : vector<4xf32>
    %312 = vector.multi_reduction <add>, %311, %cst_122 [1] : vector<4x64xf32> to vector<4xf32>
    %313 = vector.shape_cast %312 : vector<4xf32> to vector<4x1xf32>
    %cst_123 = arith.constant 6.400000e+01 : f32
    %314 = vector.broadcast %cst_123 : f32 to vector<4x1xf32>
    %315 = arith.divf %313, %314 : vector<4x1xf32>
    %316 = vector.broadcast %315 : vector<4x1xf32> to vector<4x64xf32>
    %317 = arith.subf %311, %316 : vector<4x64xf32>
    %318 = arith.mulf %317, %317 : vector<4x64xf32>
    %cst_124 = arith.constant dense<0.000000e+00> : vector<4xf32>
    %319 = vector.multi_reduction <add>, %318, %cst_124 [1] : vector<4x64xf32> to vector<4xf32>
    %320 = vector.shape_cast %319 : vector<4xf32> to vector<4x1xf32>
    %cst_125 = arith.constant 6.400000e+01 : f32
    %321 = vector.broadcast %cst_125 : f32 to vector<4x1xf32>
    %322 = arith.divf %320, %321 : vector<4x1xf32>
    %323 = vector.broadcast %315 : vector<4x1xf32> to vector<4x64xf32>
    %324 = arith.subf %311, %323 : vector<4x64xf32>
    %cst_126 = arith.constant 9.99999974E-6 : f32
    %325 = vector.broadcast %cst_126 : f32 to vector<4x1xf32>
    %326 = arith.addf %322, %325 : vector<4x1xf32>
    %327 = math.rsqrt %326 : vector<4x1xf32>
    %328 = vector.broadcast %327 : vector<4x1xf32> to vector<4x64xf32>
    %329 = arith.mulf %324, %328 : vector<4x64xf32>
    %330 = vector.extract_strided_slice %310 {offsets = [0, 64], sizes = [4, 64], strides = [1, 1]} : vector<4x128xf32> to vector<4x64xf32>
    %cst_127 = arith.constant dense<0.000000e+00> : vector<4xf32>
    %331 = vector.multi_reduction <add>, %330, %cst_127 [1] : vector<4x64xf32> to vector<4xf32>
    %332 = vector.shape_cast %331 : vector<4xf32> to vector<4x1xf32>
    %cst_128 = arith.constant 6.400000e+01 : f32
    %333 = vector.broadcast %cst_128 : f32 to vector<4x1xf32>
    %334 = arith.divf %332, %333 : vector<4x1xf32>
    %335 = vector.broadcast %334 : vector<4x1xf32> to vector<4x64xf32>
    %336 = arith.subf %330, %335 : vector<4x64xf32>
    %337 = arith.mulf %336, %336 : vector<4x64xf32>
    %cst_129 = arith.constant dense<0.000000e+00> : vector<4xf32>
    %338 = vector.multi_reduction <add>, %337, %cst_129 [1] : vector<4x64xf32> to vector<4xf32>
    %339 = vector.shape_cast %338 : vector<4xf32> to vector<4x1xf32>
    %cst_130 = arith.constant 6.400000e+01 : f32
    %340 = vector.broadcast %cst_130 : f32 to vector<4x1xf32>
    %341 = arith.divf %339, %340 : vector<4x1xf32>
    %342 = vector.broadcast %334 : vector<4x1xf32> to vector<4x64xf32>
    %343 = arith.subf %330, %342 : vector<4x64xf32>
    %cst_131 = arith.constant 9.99999974E-6 : f32
    %344 = vector.broadcast %cst_131 : f32 to vector<4x1xf32>
    %345 = arith.addf %341, %344 : vector<4x1xf32>
    %346 = math.rsqrt %345 : vector<4x1xf32>
    %347 = vector.broadcast %346 : vector<4x1xf32> to vector<4x64xf32>
    %348 = arith.mulf %343, %347 : vector<4x64xf32>
    %349 = tpu.concatenate %329, %348 in 1 : vector<4x64xf32>, vector<4x64xf32> -> vector<4x128xf32>
    %c13 = arith.constant 13 : index
    %c0_132 = arith.constant 0 : index
    %350 = vector.load %arg7[%c13, %c0_132] : memref<19x128xf32, #tpu.memory_space<vmem>>, vector<1x128xf32>
    %351 = vector.broadcast %350 : vector<1x128xf32> to vector<4x128xf32>
    %352 = arith.mulf %349, %351 : vector<4x128xf32>
    %c14 = arith.constant 14 : index
    %c0_133 = arith.constant 0 : index
    %353 = vector.load %arg7[%c14, %c0_133] : memref<19x128xf32, #tpu.memory_space<vmem>>, vector<1x128xf32>
    %354 = vector.broadcast %353 : vector<1x128xf32> to vector<4x128xf32>
    %355 = arith.addf %352, %354 : vector<4x128xf32>
    %356 = vector.extract_strided_slice %355 {offsets = [0, 0], sizes = [4, 64], strides = [1, 1]} : vector<4x128xf32> to vector<4x64xf32>
    %c256 = arith.constant 256 : index
    %c0_134 = arith.constant 0 : index
    %357 = vector.load %arg5[%c256, %c0_134] : memref<768x256xf32, #tpu.memory_space<vmem>>, vector<64x256xf32>
    %c320 = arith.constant 320 : index
    %c0_135 = arith.constant 0 : index
    %358 = vector.load %arg5[%c320, %c0_135] : memref<768x256xf32, #tpu.memory_space<vmem>>, vector<64x256xf32>
    %c2_136 = arith.constant 2 : index
    %c0_137 = arith.constant 0 : index
    %359 = vector.load %arg8[%c2_136, %c0_137] : memref<6x256xf32, #tpu.memory_space<vmem>>, vector<1x256xf32>
    %cst_138 = arith.constant dense<0.000000e+00> : vector<4x256xf32>
    %360 = tpu.matmul %356, %357, %cst_138 {dimension_numbers = #tpu.dot_dimension_numbers<[1], [0], [0], [1], [0, 0, 1, 1], [], []>} : vector<4x64xf32>, vector<64x256xf32>, vector<4x256xf32> -> vector<4x256xf32>
    %361 = vector.broadcast %359 : vector<1x256xf32> to vector<4x256xf32>
    %362 = arith.addf %360, %361 : vector<4x256xf32>
    %cst_139 = arith.constant 0.000000e+00 : f32
    %363 = vector.broadcast %cst_139 : f32 to vector<4x256xf32>
    %364 = arith.cmpf ogt, %362, %363 : vector<4x256xf32>
    %cst_140 = arith.constant 0.000000e+00 : f32
    %365 = vector.broadcast %cst_140 : f32 to vector<4x256xf32>
    %366 = arith.minimumf %362, %365 : vector<4x256xf32>
    %367 = math.exp %366 : vector<4x256xf32>
    %cst_141 = arith.constant 1.000000e+00 : f32
    %368 = vector.broadcast %cst_141 : f32 to vector<4x256xf32>
    %369 = arith.subf %367, %368 : vector<4x256xf32>
    %370 = arith.select %364, %362, %369 : vector<4x256xi1>, vector<4x256xf32>
    %cst_142 = arith.constant dense<0.000000e+00> : vector<4x64xf32>
    %371 = tpu.matmul %370, %358, %cst_142 {dimension_numbers = #tpu.dot_dimension_numbers<[1], [1], [0], [0], [0, 0, 1, 0], [], []>} : vector<4x256xf32>, vector<64x256xf32>, vector<4x64xf32> -> vector<4x64xf32>
    %372 = vector.extract_strided_slice %355 {offsets = [0, 64], sizes = [4, 64], strides = [1, 1]} : vector<4x128xf32> to vector<4x64xf32>
    %c640 = arith.constant 640 : index
    %c0_143 = arith.constant 0 : index
    %373 = vector.load %arg5[%c640, %c0_143] : memref<768x256xf32, #tpu.memory_space<vmem>>, vector<64x256xf32>
    %c704 = arith.constant 704 : index
    %c0_144 = arith.constant 0 : index
    %374 = vector.load %arg5[%c704, %c0_144] : memref<768x256xf32, #tpu.memory_space<vmem>>, vector<64x256xf32>
    %c5_145 = arith.constant 5 : index
    %c0_146 = arith.constant 0 : index
    %375 = vector.load %arg8[%c5_145, %c0_146] : memref<6x256xf32, #tpu.memory_space<vmem>>, vector<1x256xf32>
    %cst_147 = arith.constant dense<0.000000e+00> : vector<4x256xf32>
    %376 = tpu.matmul %372, %373, %cst_147 {dimension_numbers = #tpu.dot_dimension_numbers<[1], [0], [0], [1], [0, 0, 1, 1], [], []>} : vector<4x64xf32>, vector<64x256xf32>, vector<4x256xf32> -> vector<4x256xf32>
    %377 = vector.broadcast %375 : vector<1x256xf32> to vector<4x256xf32>
    %378 = arith.addf %376, %377 : vector<4x256xf32>
    %cst_148 = arith.constant 0.000000e+00 : f32
    %379 = vector.broadcast %cst_148 : f32 to vector<4x256xf32>
    %380 = arith.cmpf ogt, %378, %379 : vector<4x256xf32>
    %cst_149 = arith.constant 0.000000e+00 : f32
    %381 = vector.broadcast %cst_149 : f32 to vector<4x256xf32>
    %382 = arith.minimumf %378, %381 : vector<4x256xf32>
    %383 = math.exp %382 : vector<4x256xf32>
    %cst_150 = arith.constant 1.000000e+00 : f32
    %384 = vector.broadcast %cst_150 : f32 to vector<4x256xf32>
    %385 = arith.subf %383, %384 : vector<4x256xf32>
    %386 = arith.select %380, %378, %385 : vector<4x256xi1>, vector<4x256xf32>
    %cst_151 = arith.constant dense<0.000000e+00> : vector<4x64xf32>
    %387 = tpu.matmul %386, %374, %cst_151 {dimension_numbers = #tpu.dot_dimension_numbers<[1], [1], [0], [0], [0, 0, 1, 0], [], []>} : vector<4x256xf32>, vector<64x256xf32>, vector<4x64xf32> -> vector<4x64xf32>
    %388 = tpu.concatenate %371, %387 in 1 : vector<4x64xf32>, vector<4x64xf32> -> vector<4x128xf32>
    %c15 = arith.constant 15 : index
    %c0_152 = arith.constant 0 : index
    %389 = vector.load %arg7[%c15, %c0_152] : memref<19x128xf32, #tpu.memory_space<vmem>>, vector<1x128xf32>
    %390 = vector.broadcast %389 : vector<1x128xf32> to vector<4x128xf32>
    %391 = arith.addf %388, %390 : vector<4x128xf32>
    %392 = arith.addf %355, %391 : vector<4x128xf32>
    %393 = vector.extract_strided_slice %392 {offsets = [0, 0], sizes = [4, 64], strides = [1, 1]} : vector<4x128xf32> to vector<4x64xf32>
    %cst_153 = arith.constant dense<0.000000e+00> : vector<4xf32>
    %394 = vector.multi_reduction <add>, %393, %cst_153 [1] : vector<4x64xf32> to vector<4xf32>
    %395 = vector.shape_cast %394 : vector<4xf32> to vector<4x1xf32>
    %cst_154 = arith.constant 6.400000e+01 : f32
    %396 = vector.broadcast %cst_154 : f32 to vector<4x1xf32>
    %397 = arith.divf %395, %396 : vector<4x1xf32>
    %398 = vector.broadcast %397 : vector<4x1xf32> to vector<4x64xf32>
    %399 = arith.subf %393, %398 : vector<4x64xf32>
    %400 = arith.mulf %399, %399 : vector<4x64xf32>
    %cst_155 = arith.constant dense<0.000000e+00> : vector<4xf32>
    %401 = vector.multi_reduction <add>, %400, %cst_155 [1] : vector<4x64xf32> to vector<4xf32>
    %402 = vector.shape_cast %401 : vector<4xf32> to vector<4x1xf32>
    %cst_156 = arith.constant 6.400000e+01 : f32
    %403 = vector.broadcast %cst_156 : f32 to vector<4x1xf32>
    %404 = arith.divf %402, %403 : vector<4x1xf32>
    %405 = vector.broadcast %397 : vector<4x1xf32> to vector<4x64xf32>
    %406 = arith.subf %393, %405 : vector<4x64xf32>
    %cst_157 = arith.constant 9.99999974E-6 : f32
    %407 = vector.broadcast %cst_157 : f32 to vector<4x1xf32>
    %408 = arith.addf %404, %407 : vector<4x1xf32>
    %409 = math.rsqrt %408 : vector<4x1xf32>
    %410 = vector.broadcast %409 : vector<4x1xf32> to vector<4x64xf32>
    %411 = arith.mulf %406, %410 : vector<4x64xf32>
    %412 = vector.extract_strided_slice %392 {offsets = [0, 64], sizes = [4, 64], strides = [1, 1]} : vector<4x128xf32> to vector<4x64xf32>
    %cst_158 = arith.constant dense<0.000000e+00> : vector<4xf32>
    %413 = vector.multi_reduction <add>, %412, %cst_158 [1] : vector<4x64xf32> to vector<4xf32>
    %414 = vector.shape_cast %413 : vector<4xf32> to vector<4x1xf32>
    %cst_159 = arith.constant 6.400000e+01 : f32
    %415 = vector.broadcast %cst_159 : f32 to vector<4x1xf32>
    %416 = arith.divf %414, %415 : vector<4x1xf32>
    %417 = vector.broadcast %416 : vector<4x1xf32> to vector<4x64xf32>
    %418 = arith.subf %412, %417 : vector<4x64xf32>
    %419 = arith.mulf %418, %418 : vector<4x64xf32>
    %cst_160 = arith.constant dense<0.000000e+00> : vector<4xf32>
    %420 = vector.multi_reduction <add>, %419, %cst_160 [1] : vector<4x64xf32> to vector<4xf32>
    %421 = vector.shape_cast %420 : vector<4xf32> to vector<4x1xf32>
    %cst_161 = arith.constant 6.400000e+01 : f32
    %422 = vector.broadcast %cst_161 : f32 to vector<4x1xf32>
    %423 = arith.divf %421, %422 : vector<4x1xf32>
    %424 = vector.broadcast %416 : vector<4x1xf32> to vector<4x64xf32>
    %425 = arith.subf %412, %424 : vector<4x64xf32>
    %cst_162 = arith.constant 9.99999974E-6 : f32
    %426 = vector.broadcast %cst_162 : f32 to vector<4x1xf32>
    %427 = arith.addf %423, %426 : vector<4x1xf32>
    %428 = math.rsqrt %427 : vector<4x1xf32>
    %429 = vector.broadcast %428 : vector<4x1xf32> to vector<4x64xf32>
    %430 = arith.mulf %425, %429 : vector<4x64xf32>
    %431 = tpu.concatenate %411, %430 in 1 : vector<4x64xf32>, vector<4x64xf32> -> vector<4x128xf32>
    %c16 = arith.constant 16 : index
    %c0_163 = arith.constant 0 : index
    %432 = vector.load %arg7[%c16, %c0_163] : memref<19x128xf32, #tpu.memory_space<vmem>>, vector<1x128xf32>
    %433 = vector.broadcast %432 : vector<1x128xf32> to vector<4x128xf32>
    %434 = arith.mulf %431, %433 : vector<4x128xf32>
    %c17 = arith.constant 17 : index
    %c0_164 = arith.constant 0 : index
    %435 = vector.load %arg7[%c17, %c0_164] : memref<19x128xf32, #tpu.memory_space<vmem>>, vector<1x128xf32>
    %436 = vector.broadcast %435 : vector<1x128xf32> to vector<4x128xf32>
    %437 = arith.addf %434, %436 : vector<4x128xf32>
    %c18 = arith.constant 18 : index
    %c0_165 = arith.constant 0 : index
    %438 = vector.load %arg7[%c18, %c0_165] : memref<19x128xf32, #tpu.memory_space<vmem>>, vector<1x128xf32>
    %439 = vector.extract_strided_slice %437 {offsets = [0, 0], sizes = [4, 64], strides = [1, 1]} : vector<4x128xf32> to vector<4x64xf32>
    %c0_166 = arith.constant 0 : index
    %c0_167 = arith.constant 0 : index
    %440 = vector.load %arg6[%c0_166, %c0_167] : memref<32x64xf32, #tpu.memory_space<vmem>>, vector<12x64xf32>
    %cst_168 = arith.constant dense<0.000000e+00> : vector<4x12xf32>
    %441 = tpu.matmul %439, %440, %cst_168 {dimension_numbers = #tpu.dot_dimension_numbers<[1], [1], [0], [0], [0, 0, 1, 0], [], []>} : vector<4x64xf32>, vector<12x64xf32>, vector<4x12xf32> -> vector<4x12xf32>
    %442 = vector.extract_strided_slice %438 {offsets = [0, 0], sizes = [1, 12], strides = [1, 1]} : vector<1x128xf32> to vector<1x12xf32>
    %443 = vector.broadcast %442 : vector<1x12xf32> to vector<4x12xf32>
    %444 = arith.addf %441, %443 : vector<4x12xf32>
    %445 = vector.extract_strided_slice %40 {offsets = [0, 0], sizes = [4, 1], strides = [1, 1]} : vector<4x2xf32> to vector<4x1xf32>
    %446 = vector.broadcast %445 : vector<4x1xf32> to vector<4x12xf32>
    %447 = arith.mulf %444, %446 : vector<4x12xf32>
    %448 = vector.extract_strided_slice %437 {offsets = [0, 64], sizes = [4, 64], strides = [1, 1]} : vector<4x128xf32> to vector<4x64xf32>
    %c16_169 = arith.constant 16 : index
    %c0_170 = arith.constant 0 : index
    %449 = vector.load %arg6[%c16_169, %c0_170] : memref<32x64xf32, #tpu.memory_space<vmem>>, vector<12x64xf32>
    %cst_171 = arith.constant dense<0.000000e+00> : vector<4x12xf32>
    %450 = tpu.matmul %448, %449, %cst_171 {dimension_numbers = #tpu.dot_dimension_numbers<[1], [1], [0], [0], [0, 0, 1, 0], [], []>} : vector<4x64xf32>, vector<12x64xf32>, vector<4x12xf32> -> vector<4x12xf32>
    %451 = vector.extract_strided_slice %438 {offsets = [0, 64], sizes = [1, 12], strides = [1, 1]} : vector<1x128xf32> to vector<1x12xf32>
    %452 = vector.broadcast %451 : vector<1x12xf32> to vector<4x12xf32>
    %453 = arith.addf %450, %452 : vector<4x12xf32>
    %454 = vector.extract_strided_slice %40 {offsets = [0, 1], sizes = [4, 1], strides = [1, 1]} : vector<4x2xf32> to vector<4x1xf32>
    %455 = vector.broadcast %454 : vector<4x1xf32> to vector<4x12xf32>
    %456 = arith.mulf %453, %455 : vector<4x12xf32>
    %457 = arith.addf %447, %456 : vector<4x12xf32>
    %c0_172 = arith.constant 0 : index
    %c0_173 = arith.constant 0 : index
    %458 = vector.load %arg9[%c0_172, %c0_173] : memref<4x12xf32, #tpu.memory_space<vmem>>, vector<4x12xf32>
    tpu.vector_store %arg9[%c0_172, %c0_173], %457 {strides = array<i32>} : memref<4x12xf32, #tpu.memory_space<vmem>>, vector<4x12xf32>,
    return
  }
}

</mosaic_0001>

<bundles_post_ra>
// kernel: forward.1
= control target key start
LH: loop header
LB: loop body
LE: loop exit
PB: predicated region body
PF: predicated region fallthrough
CT: control target
= control target key end

     0   :  { %14 = vsyncpa [#allocation3], 0  ;;  %s2362_s0 = inlined_call_operand.vmem [shape: f32[4,16], index: 0, kind: input, shape index: {}]   ;;  %s2363_s1 = inlined_call_operand.vmem [shape: f32[66,32], index: 1, kind: input, shape index: {}]   ;;  %s2364_s2 = inlined_call_operand.vmem [shape: f32[3,32], index: 2, kind: input, shape index: {}]   ;;  %s2365_s3 = inlined_call_operand.vmem [shape: f32[128,16], index: 3, kind: input, shape index: {}]   ;;  %s2366_s4 = inlined_call_operand.hbm [shape: f32[256,128], index: 4, kind: input, shape index: {}]   ;;  %s2367_s5 = inlined_call_operand.hbm [shape: f32[768,256], index: 5, kind: input, shape index: {}]   ;;  %s2368_s6 = inlined_call_operand.vmem [shape: f32[32,64], index: 6, kind: input, shape index: {}]   ;;  %s2369_s7 = inlined_call_operand.vmem [shape: f32[19,128], index: 7, kind: input, shape index: {}]   ;;  %s2370_s8 = inlined_call_operand.vmem [shape: f32[6,256], index: 8, kind: input, shape index: {}]   ;;  %s2371_s9 = inlined_call_operand.hbm [shape: f32[4,12], index: 9, kind: output, shape index: {}]  }
   0x1   :  { %15 = vsyncpa [#allocation6], 0 }
   0x2   :  { %16 = vsyncpa [#allocation4], 0  ;;  %s29_s11 = sshll.u32 %s2366_s4, 4  ;;  %s1914_s12 = smov [#allocation2]   ;;  %s30_s11 = int_to_ptr.hbm [resolvable:$true] %s29_s11 }
   0x3   :  { %s31_s13 = sshll.u32 %s1914_s12, 4  ;;  %s42_s16 = sshll.u32 %s2367_s5, 4  ;;  %s32_s13 = int_to_ptr.vmem [resolvable:$true] %s31_s13  ;;  %s43_s16 = int_to_ptr.hbm [resolvable:$true] %s42_s16 }
   0x4   :  { %s1915_s17 = smov 128   ;;  %s1916_s18 = smov 8  }
   0x5   :  { %37 = dma.hbm_to_vmem [thread:$0]  %s30_s11, 4096, %s32_s13, [#allocation3], %s1915_s17, %s1915_s17, %s1916_s18  }
   0x6   :  { %s1917_s19 = smov [#allocation5]   ;;  %s1918_s21 = smov 256  }
   0x7   :  { %s44_s20 = sshll.u32 %s1917_s19, 4  ;;  %s1919_s22 = smov 16   ;;  %s45_s20 = int_to_ptr.vmem [resolvable:$true] %s44_s20 }
   0x8   :  { %50 = dma.hbm_to_vmem [thread:$0]  %s43_s16, 24576, %s45_s20, [#allocation6], %s1918_s21, %s1918_s21, %s1919_s22  }
   0x9   :  { %1908 = dma.done.wait [#allocation3], 4096  }
   0xa   :  { %1909 = vsyncadd [#allocation3], 4294963200 }
   0xb   :  { %1910 = dma.done.wait [#allocation6], 24576  }
   0xc   :  { %1911 = vsyncadd [#allocation6], 4294942720  ;;  %vm72_vm0 = vcmask 130048   ;;  %v231_v0 = vld [vmem:[%s2365_s3 + $0x78] sm:$0xff]  ;;  %v230_v1 = vld [vmem:[%s2365_s3 + $0x70] sm:$0xff]  ;;  %vm302_vm1 = vcmask 519168  }
   0xd   :  { %1690 = vmatpush.xpose.msk.msra.mxu3 %vm72_vm0, %v231_v0  ;;  %v229_v2 = vld [vmem:[%s2365_s3 + $0x68] sm:$0xff]  ;;  %v228_v3 = vld [vmem:[%s2365_s3 + $0x60] sm:$0xff]  ;;  %v227_v4 = vld [vmem:[%s2365_s3 + $0x58] sm:$0xff]  ;;  %s1920_s13 = smov 64   ;;  %v1921_v21 = vmov 64.0   ;;  %vm120_vm3 = vcmask 261120  }
   0xe   :  { %v226_v5 = vld [vmem:[%s2365_s3 + $0x50] sm:$0xff]  ;;  %v225_v6 = vld [vmem:[%s2365_s3 + $0x48] sm:$0xff]  ;;  %v224_v7 = vld [vmem:[%s2365_s3 + $0x40] sm:$0xff]  ;;  %1778 = vrcp.f32 %v1921_v21  ;;  %vm362_vm12 = vcmask 523264   ;;  %s1665_s16 = sshll.u32 %s2371_s9, 4  ;;  %s1666_s16 = int_to_ptr.hbm [resolvable:$true] %s1665_s16 }
   0xf   :  { %v223_v8 = vld [vmem:[%s2365_s3 + $0x38] sm:$0xff]  ;;  %v222_v9 = vld [vmem:[%s2365_s3 + $0x30] sm:$0xff]  ;;  %v221_v10 = vld [vmem:[%s2365_s3 + $0x28] sm:$0xff] }
  0x10   :  { %v220_v11 = vld [vmem:[%s2365_s3 + $0x20] sm:$0xff]  ;;  %v219_v12 = vld [vmem:[%s2365_s3 + $0x18] sm:$0xff]  ;;  %v218_v13 = vld [vmem:[%s2365_s3 + $0x10] sm:$0xff] }
  0x11   :  { %1691 = vmatpush.xpose.msk.msra.mxu3 %vm72_vm0, %v230_v1  ;;  %v217_v14 = vld [vmem:[%s2365_s3 + $0x8] sm:$0xff]  ;;  %v216_v15 = vld [vmem:[%s2365_s3] sm:$0xff]  ;;  %v69_v22 = vld [vmem:[%s2363_s1 + $0x18] sm:$0xff] }
  0x12   :  { %v65_v16 = vld [vmem:[%s2362_s0] sm:$0xf]  ;;  %1676 = vmatpush.xpose.msk.msra.mxu0 %vm72_vm0, %v69_v22  ;;  %v68_v23 = vld [vmem:[%s2363_s1 + $0x10] sm:$0xff]  ;;  %v67_v26 = vld [vmem:[%s2363_s1 + $0x8] sm:$0xff] }
  0x13   :  { %v1756_v17 = vld [vmem:[%s2369_s7] ss:$0 sm:$0xff]  ;;  %v117_v40 = vld [vmem:[%s2363_s1 + $0x38] sm:$0xff]  ;;  %v116_v43 = vld [vmem:[%s2363_s1 + $0x30] sm:$0xff] }
  0x14   :  { %v1779_v24 = vpop.eup %1778  ;;  %v66_v28 = vld [vmem:[%s2363_s1] sm:$0xff]  ;;  %1682 = vmatpush.xpose.msk.msra.mxu1 %vm120_vm3, %v117_v40  ;;  %v115_v49 = vld [vmem:[%s2363_s1 + $0x28] sm:$0xff]  ;;  %v384_v0 = vld [vmem:[#allocation5 + $0x70] sm:$0xff] }
  0x15   :  { %1692 = vmatpush.xpose.msk.msra.mxu3 %vm72_vm0, %v229_v2  ;;  %v307_v25 = vmul.f32 64.0, %v1779_v24  ;;  %vm311_vm2 = vweird.f32 %v1779_v24  ;;  %v1757_v39 = vld [vmem:[%s2364_s2] ss:$0 sm:$0xff]  ;;  %v1758_v57 = vld [vmem:[%s2364_s2 + $0x1] ss:$0 sm:$0xff]  ;;  %v385_v1 = vld [vmem:[#allocation5 + $0x78] sm:$0xff]  ;;  %419 = vmatpush.msra.mxu2 %v384_v0 }
  0x16   :  { %1677 = vmatpush.xpose.msk.msra.mxu0 %vm72_vm0, %v68_v23  ;;  %v114_v51 = vld [vmem:[%s2363_s1 + $0x20] sm:$0xff]  ;;  %v517_v22 = vld [vmem:[#allocation5 + $0x370] sm:$0xff]  ;;  %v399_v0 = vld [vmem:[#allocation5 + $0xe8] sm:$0xff] }
  0x17   :  { %v308_v27 = vsub.f32 1.0, %v307_v25  ;;  %v162_v63 = vld [vmem:[%s2363_s1 + $0x40] sm:$0x3] }
  0x18   :  { %1683 = vmatpush.xpose.msk.msra.mxu1 %vm120_vm3, %v116_v43  ;;  %v515_v23 = vld [vmem:[#allocation5 + $0x360] sm:$0xff] }
  0x19   :  { %1693 = vmatpush.xpose.msk.msra.mxu3 %vm72_vm0, %v228_v3  ;;  %v309_v29 = vmul.f32 %v1779_v24, %v308_v27  ;;  %v382_v3 = vld [vmem:[#allocation5 + $0x60] sm:$0xff]  ;;  %v513_v27 = vld [vmem:[#allocation5 + $0x350] sm:$0xff] }
  0x1a   :  { %1678 = vmatpush.xpose.msk.msra.mxu0 %vm72_vm0, %v67_v26  ;;  %420 = vmatpush.msra.mxu2 %v382_v3  ;;  %v395_v3 = vld [vmem:[#allocation5 + $0xc8] sm:$0xff] }
  0x1b   :  { %v310_v30 = vadd.f32 %v1779_v24, %v309_v29  ;;  %v511_v29 = vld [vmem:[#allocation5 + $0x340] sm:$0xff] }
  0x1c   :  { %1684 = vmatpush.xpose.msk.msra.mxu1 %vm120_vm3, %v115_v49  ;;  %v1759_v49 = vld [vmem:[%s2369_s7 + $0x1] ss:$0 sm:$0xff] }
  0x1d   :  { %1694 = vmatpush.xpose.msk.msra.mxu3 %vm72_vm0, %v227_v4  ;;  %v2071_v32 = vsel %vm311_vm2, %v1779_v24, %v310_v30  ;;  %v383_v4 = vld [vmem:[#allocation5 + $0x68] sm:$0xff] }
  0x1e   :  { %1679 = vmatpush.xpose.msk.msra.mxu0 %vm72_vm0, %v66_v28 }
  0x20   :  { %1685 = vmatpush.xpose.msk.msra.mxu1 %vm120_vm3, %v114_v51 }
  0x21   :  { %1695 = vmatpush.xpose.msk.msra.mxu3 %vm72_vm0, %v226_v5  ;;  %1680 = vmatmul.msk.f32.vlgmr.msra.gmra.mxu0 %vm72_vm0, %v65_v16 }
  0x22   :  { %1688 = vmatpush.xpose.msk.msrb.mxu0 %vm120_vm3, %v162_v63  ;;  %v400_v63 = vld [vmem:[#allocation5 + $0xf0] sm:$0xff] }
  0x24   :  { %471 = vmatpush.xpose.msrb.mxu1 %v400_v63 }
  0x25   :  { %1696 = vmatpush.xpose.msk.msra.mxu3 %vm72_vm0, %v225_v6  ;;  %v380_v6 = vld [vmem:[#allocation5 + $0x50] sm:$0xff] }
  0x26   :  { %439 = vmatpush.msra.mxu0 %v385_v1  ;;  %421 = vmatpush.msra.mxu2 %v380_v6  ;;  %v398_v1 = vld [vmem:[#allocation5 + $0xe0] sm:$0xff]  ;;  %v393_v6 = vld [vmem:[#allocation5 + $0xb8] sm:$0xff] }
  0x28   :  { %440 = vmatpush.msra.mxu0 %v383_v4  ;;  %472 = vmatpush.xpose.msrb.mxu1 %v398_v1 }
  0x29   :  { %1697 = vmatpush.xpose.msk.msra.mxu3 %vm72_vm0, %v224_v7  ;;  %v381_v7 = vld [vmem:[#allocation5 + $0x58] sm:$0xff] }
  0x2a   :  { %441 = vmatpush.msra.mxu0 %v381_v7  ;;  %v394_v7 = vld [vmem:[#allocation5 + $0xc0] sm:$0xff] }
  0x2d   :  { %1698 = vmatpush.xpose.msk.msra.mxu3 %vm72_vm0, %v223_v8 }
  0x31   :  { %1699 = vmatpush.xpose.msk.msra.mxu3 %vm72_vm0, %v222_v9 }
  0x35   :  { %1700 = vmatpush.xpose.msk.msra.mxu3 %vm72_vm0, %v221_v10  ;;  %v378_v10 = vld [vmem:[#allocation5 + $0x40] sm:$0xff] }
  0x36   :  { %422 = vmatpush.msra.mxu2 %v378_v10  ;;  %v389_v10 = vld [vmem:[#allocation5 + $0x98] sm:$0xff] }
  0x39   :  { %1701 = vmatpush.xpose.msk.msra.mxu3 %vm72_vm0, %v220_v11  ;;  %v379_v11 = vld [vmem:[#allocation5 + $0x48] sm:$0xff] }
  0x3a   :  { %442 = vmatpush.msra.mxu0 %v379_v11  ;;  %v390_v11 = vld [vmem:[#allocation5 + $0xa0] sm:$0xff] }
  0x3d   :  { %1702 = vmatpush.xpose.msk.msra.mxu3 %vm72_vm0, %v219_v12 }
  0x41   :  { %1703 = vmatpush.xpose.msk.msra.mxu3 %vm72_vm0, %v218_v13  ;;  %v376_v13 = vld [vmem:[#allocation5 + $0x30] sm:$0xff] }
  0x42   :  { %423 = vmatpush.msra.mxu2 %v376_v13  ;;  %v388_v13 = vld [vmem:[#allocation5 + $0x90] sm:$0xff] }
  0x45   :  { %1704 = vmatpush.xpose.msk.msra.mxu3 %vm72_vm0, %v217_v14  ;;  %v377_v14 = vld [vmem:[#allocation5 + $0x38] sm:$0xff] }
  0x46   :  { %443 = vmatpush.msra.mxu0 %v377_v14  ;;  %v386_v14 = vld [vmem:[#allocation5 + $0x80] sm:$0xff] }
  0x49   :  { %1705 = vmatpush.xpose.msk.msra.mxu3 %vm72_vm0, %v216_v15  ;;  %v374_v15 = vld [vmem:[#allocation5 + $0x20] sm:$0xff] }
  0x4a   :  { %424 = vmatpush.msra.mxu2 %v374_v15 }
  0x4c   :  { %1706 = vmatmul.msk.f32.vlgmr.msra.gmra.mxu3 %vm72_vm0, %v65_v16  ;;  %v375_v16 = vld [vmem:[#allocation5 + $0x28] sm:$0xff] }
  0x4d   :  { %444 = vmatpush.msra.mxu0 %v375_v16  ;;  %v533_v16 = vld [vmem:[#allocation5 + $0x3f0] sm:$0xff] }
  0x9e   :  { %v105_v44 = vpop.f32.mrf.mxu0 }
  0x9f   :  { %v106_v46 = vadd.f32 %v1757_v39, %v105_v44 }
  0xa1   :  { %v109_v48 = vmin.f32 %v106_v46, 0.0  ;;  %vm108_vm4 = vcmp.gt.f32.partialorder %v106_v46, 0.0 }
  0xa3   :  { %v110_v50 = vmul.f32 1.442695, %v109_v48 }
  0xa5   :  { %1780 = vpow2.f32 %v110_v50 }
  0xab   :  { %v1781_v52 = vpop.eup %1780 }
  0xac   :  { %v1681_v53 = vadd.f32 -1.0, %v1781_v52  ;;  %v1760_v52 = vld [vmem:[%s2369_s7 + $0x2] ss:$0 sm:$0xff] }
  0xae   :  { %v113_v54 = vsel %vm108_vm4, %v106_v46, %v1681_v53 }
  0xaf   :  { %1686 = vmatmul.msk.f32.vlgmr.msra.gmra.mxu1 %vm120_vm3, %v113_v54 }
  0xcf   :  { %v299_v18 = vpop.f32.mrf.mxu3 }
  0xd0   :  { %v300_v19 = vadd.f32 %v1756_v17, %v299_v18  ;;  %v372_v17 = vld [vmem:[#allocation5 + $0x10] sm:$0xff]  ;;  %v373_v18 = vld [vmem:[#allocation5 + $0x18] sm:$0xff] }
  0xd1   :  { %425 = vmatpush.msra.mxu2 %v372_v17  ;;  %445 = vmatpush.msra.mxu0 %v373_v18  ;;  %v534_v17 = vld [vmem:[#allocation5 + $0x3f8] sm:$0xff]  ;;  %v531_v18 = vld [vmem:[#allocation5 + $0x3e0] sm:$0xff] }
  0xd2   :  { %333 = vrot.lane.b32.xlu0 %v300_v19, %s1920_s13  ;;  %v303_v20 = vsel %vm302_vm1, %v300_v19, 0.0 }
  0xd3   :  { %304 = vadd.xlane.f32.xlu1 %v303_v20  ;;  %v371_v20 = vld [vmem:[#allocation5 + $0x8] sm:$0xff] }
  0xd4   :  { %446 = vmatpush.msra.mxu0 %v371_v20  ;;  %v402_v20 = vld [vmem:[%s2370_s8] ss:$8 sm:$0x3] }
 0x12c   :  { %v153_v58 = vpop.f32.mrf.mxu1 }
 0x12d   :  { %v154_v59 = vadd.f32 %v1758_v57, %v153_v58  ;;  %v512_v57 = vld [vmem:[#allocation5 + $0x348] sm:$0xff]  ;;  %v510_v58 = vld [vmem:[#allocation5 + $0x338] sm:$0xff] }
 0x12f   :  { %v157_v60 = vmin.f32 %v154_v59, 0.0  ;;  %vm156_vm5 = vcmp.gt.f32.partialorder %v154_v59, 0.0 }
 0x131   :  { %v158_v61 = vmul.f32 1.442695, %v157_v60  ;;  %v506_v60 = vld [vmem:[#allocation5 + $0x318] sm:$0xff] }
 0x133   :  { %1782 = vpow2.f32 %v158_v61  ;;  %v504_v61 = vld [vmem:[#allocation5 + $0x308] sm:$0xff] }
 0x139   :  { %v1783_v5 = vpop.eup %1782 }
 0x13a   :  { %v1687_v9 = vadd.f32 -1.0, %v1783_v5  ;;  %v396_v5 = vld [vmem:[#allocation5 + $0xd0] sm:$0xff] }
 0x13b   :  { %473 = vmatpush.xpose.msrb.mxu1 %v396_v5 }
 0x13c   :  { %v161_v12 = vsel %vm156_vm5, %v154_v59, %v1687_v9  ;;  %v508_v59 = vld [vmem:[#allocation5 + $0x328] sm:$0xff]  ;;  %v392_v9 = vld [vmem:[#allocation5 + $0xb0] sm:$0xff] }
 0x13d   :  { %1689 = vmatmul.msk.f32.vlgmr.msrb.gmra.mxu0 %vm120_vm3, %v161_v12  ;;  %v387_v12 = vld [vmem:[#allocation5 + $0x88] sm:$0xff] }
 0x13e   :  { %554 = vmatpush.msrb.mxu0 %v517_v22  ;;  %v405_v22 = vperm.slane %v402_v20, 1 }
 0x13f   :  { %474 = vmatpush.xpose.msrb.mxu1 %v394_v7 }
 0x140   :  { %555 = vmatpush.msrb.mxu0 %v515_v23 }
 0x142   :  { %556 = vmatpush.msrb.mxu0 %v513_v27 }
 0x143   :  { %475 = vmatpush.xpose.msrb.mxu1 %v392_v9  ;;  %v1762_v9 = vld [vmem:[%s2369_s7 + $0x3] ss:$0 sm:$0xff] }
 0x144   :  { %v334_v31 = vpop.permute.xlu0 %333  ;;  %557 = vmatpush.msrb.mxu0 %v511_v29 }
 0x145   :  { %v336_v33 = vsel %vm302_vm1, %v334_v31, 0.0  ;;  %v509_v31 = vld [vmem:[#allocation5 + $0x330] sm:$0xff] }
 0x146   :  { %337 = vadd.xlane.f32.xlu0 %v336_v33  ;;  %v305_v34 = vpop.xlane.xlu1 %304  ;;  %v507_v33 = vld [vmem:[#allocation5 + $0x320] sm:$0xff]  ;;  %558 = vmatpush.msrb.mxu0 %v509_v31 }
 0x147   :  { %v313_v35 = vmul.f32 %v2071_v32, %v305_v34  ;;  %476 = vmatpush.xpose.msrb.mxu1 %v390_v11 }
 0x148   :  { %559 = vmatpush.msrb.mxu0 %v507_v33 }
 0x149   :  { %v2075_v36 = vsub.f32 %v300_v19, %v313_v35  ;;  %v505_v35 = vld [vmem:[#allocation5 + $0x310] sm:$0xff] }
 0x14a   :  { %560 = vmatpush.msrb.mxu0 %v505_v35 }
 0x14b   :  { %v315_v37 = vmul.f32 %v2075_v36, %v2075_v36  ;;  %477 = vmatpush.xpose.msrb.mxu1 %v388_v13 }
 0x14d   :  { %v316_v38 = vsel %vm302_vm1, %v315_v37, 0.0 }
 0x14e   :  { %317 = vadd.xlane.f32.xlu2 %v316_v38  ;;  %v503_v38 = vld [vmem:[#allocation5 + $0x300] sm:$0xff] }
 0x14f   :  { %561 = vmatpush.msrb.mxu0 %v503_v38  ;;  %478 = vmatpush.xpose.msrb.mxu1 %v386_v14 }
 0x153   :  { %606 = vmatpush.xpose.msra.mxu1 %v533_v16 }
 0x157   :  { %607 = vmatpush.xpose.msra.mxu1 %v531_v18 }
 0x1b9   :  { %v338_v41 = vpop.xlane.xlu0 %337 }
 0x1ba   :  { %v339_v42 = vmul.f32 %v338_v41, %v2071_v32  ;;  %v2136_v15 = vpop.f32.mrf.mxu0 }
 0x1bc   :  { %v2091_v45 = vsub.f32 %v300_v19, %v339_v42  ;;  %v370_v19 = vld [vmem:[#allocation5] sm:$0xff] }
 0x1bd   :  { %426 = vmatpush.msra.mxu2 %v370_v19  ;;  %v532_v19 = vld [vmem:[#allocation5 + $0x3e8] sm:$0xff] }
 0x1be   :  { %v341_v47 = vmul.f32 %v2091_v45, %v2091_v45 }
 0x1c0   :  { %343 = vrot.lane.b32.xlu1 %v341_v47, %s1920_s13 }
 0x1c1   :  { %v318_v62 = vpop.xlane.xlu2 %317 }
 0x1c2   :  { %v319_v2 = vmul.f32 %v318_v62, %v2071_v32  ;;  %v401_v62 = vld [vmem:[#allocation5 + $0xf8] sm:$0xff] }
 0x1c3   :  { %491 = vmatpush.xpose.msrb.mxu2 %v401_v62 }
 0x1c4   :  { %v320_v8 = vadd.f32 1e-05, %v319_v2  ;;  %v397_v2 = vld [vmem:[#allocation5 + $0xd8] sm:$0xff] }
 0x1c6   :  { %1784 = vrsqrt.f32 %v320_v8  ;;  %vm327_vm7 = vweird.f32 %v320_v8 }
 0x1c7   :  { %492 = vmatpush.xpose.msrb.mxu2 %v399_v0 }
 0x1cb   :  { %493 = vmatpush.xpose.msrb.mxu2 %v397_v2 }
 0x1cc   :  { %v1785_v21 = vpop.eup %1784 }
 0x1cd   :  { %v322_v24 = vmul.f32 %v1785_v21, %v320_v8  ;;  %vm328_vm6 = vweird.f32 %v1785_v21  ;;  %v391_v8 = vld [vmem:[#allocation5 + $0xa8] sm:$0xff] }
 0x1ce   :  { %vm329_vm9 = vmor %vm327_vm7, %vm328_vm6 }
 0x1cf   :  { %v323_v30 = vmul.f32 %v1785_v21, %v322_v24  ;;  %494 = vmatpush.xpose.msrb.mxu2 %v395_v3  ;;  %v527_v24 = vld [vmem:[#allocation5 + $0x3c0] sm:$0xff] }
 0x1d1   :  { %v324_v34 = vmul.f32 0.5, %v323_v30 }
 0x1d3   :  { %v325_v39 = vsub.f32 1.5, %v324_v34  ;;  %495 = vmatpush.xpose.msrb.mxu2 %v393_v6 }
 0x1d5   :  { %v326_v42 = vmul.f32 %v1785_v21, %v325_v39 }
 0x1d7   :  { %v330_v46 = vsel %vm329_vm9, %v1785_v21, %v326_v42  ;;  %496 = vmatpush.xpose.msrb.mxu2 %v391_v8  ;;  %v529_v21 = vld [vmem:[#allocation5 + $0x3d0] sm:$0xff]  ;;  %v530_v42 = vld [vmem:[#allocation5 + $0x3d8] sm:$0xff] }
 0x1d8   :  { %v331_v50 = vmul.f32 %v330_v46, %v2075_v36  ;;  %v516_v36 = vld [vmem:[#allocation5 + $0x368] sm:$0xff]  ;;  %608 = vmatpush.xpose.msra.mxu1 %v529_v21  ;;  %v521_v46 = vld [vmem:[#allocation5 + $0x390] sm:$0xff] }
 0x1db   :  { %497 = vmatpush.xpose.msrb.mxu2 %v389_v10 }
 0x1dc   :  { %609 = vmatpush.xpose.msra.mxu1 %v527_v24 }
 0x1df   :  { %498 = vmatpush.xpose.msrb.mxu2 %v387_v12 }
 0x232   :  { %v344_v55 = vpop.permute.xlu1 %343 }
 0x233   :  { %v346_v56 = vsel %vm302_vm1, %v344_v55, 0.0 }
 0x234   :  { %347 = vadd.xlane.f32.xlu2 %v346_v56  ;;  %v518_v56 = vld [vmem:[#allocation5 + $0x378] sm:$0xff] }
 0x2a7   :  { %v348_v25 = vpop.xlane.xlu2 %347 }
 0x2a8   :  { %v349_v26 = vmul.f32 %v348_v25, %v2071_v32 }
 0x2aa   :  { %v350_v28 = vadd.f32 1e-05, %v349_v26  ;;  %v404_v26 = vperm.slane %v402_v20, 0 }
 0x2ac   :  { %1786 = vrsqrt.f32 %v350_v28  ;;  %vm357_vm10 = vweird.f32 %v350_v28 }
 0x2b2   :  { %v1787_v37 = vpop.eup %1786 }
 0x2b3   :  { %v352_v40 = vmul.f32 %v1787_v37, %v350_v28  ;;  %vm358_vm8 = vweird.f32 %v1787_v37 }
 0x2b4   :  { %vm359_vm11 = vmor %vm357_vm10, %vm358_vm8 }
 0x2b5   :  { %v353_v41 = vmul.f32 %v1787_v37, %v352_v40 }
 0x2b7   :  { %v354_v43 = vmul.f32 0.5, %v353_v41  ;;  %v525_v41 = vld [vmem:[#allocation5 + $0x3b0] sm:$0xff] }
 0x2b8   :  { %610 = vmatpush.xpose.msra.mxu1 %v525_v41  ;;  %v713_v41 = vld [vmem:[#allocation2 + $0x38] sm:$0xff] }
 0x2b9   :  { %v355_v44 = vsub.f32 1.5, %v354_v43  ;;  %v523_v43 = vld [vmem:[#allocation5 + $0x3a0] sm:$0xff] }
 0x2bb   :  { %v356_v47 = vmul.f32 %v1787_v37, %v355_v44  ;;  %v528_v44 = vld [vmem:[#allocation5 + $0x3c8] sm:$0xff] }
 0x2bc   :  { %611 = vmatpush.xpose.msra.mxu1 %v523_v43 }
 0x2bd   :  { %v360_v48 = vsel %vm359_vm11, %v1787_v37, %v356_v47  ;;  %v526_v47 = vld [vmem:[#allocation5 + $0x3b8] sm:$0xff] }
 0x2be   :  { %v361_v51 = vmul.f32 %v360_v48, %v2091_v45  ;;  %v514_v45 = vld [vmem:[#allocation5 + $0x358] sm:$0xff]  ;;  %v519_v48 = vld [vmem:[#allocation5 + $0x380] sm:$0xff] }
 0x2c0   :  { %v363_v53 = vsel %vm362_vm12, %v331_v50, %v361_v51  ;;  %612 = vmatpush.xpose.msra.mxu1 %v521_v46  ;;  %v522_v50 = vld [vmem:[#allocation5 + $0x398] sm:$0xff]  ;;  %v520_v51 = vld [vmem:[#allocation5 + $0x388] sm:$0xff]  ;;  %v710_v46 = vld [vmem:[#allocation2 + $0x20] sm:$0xff] }
 0x2c1   :  { %v366_v54 = vmul.f32 %v1759_v49, %v363_v53  ;;  %v524_v49 = vld [vmem:[#allocation5 + $0x3a8] sm:$0xff] }
 0x2c3   :  { %v2126_v55 = vadd.f32 %v1760_v52, %v366_v54  ;;  %v1711_v52 = vld [vmem:[%s2370_s8 + $0x3] ss:$8 sm:$0x3] }
 0x2c4   :  { %613 = vmatpush.xpose.msra.mxu1 %v519_v48  ;;  %v538_v53 = vperm.slane %v1711_v52, 0  ;;  %v708_v48 = vld [vmem:[#allocation2 + $0x10] sm:$0xff] }
 0x2c5   :  { %542 = vrot.lane.b32.xlu2 %v2126_v55, %s1920_s13  ;;  %1707 = vmatmul.msk.f32.vlgmr.msra.gmra.mxu2 %vm362_vm12, %v2126_v55 }
 0x2c6   :  { %1708 = vmatmul.msk.f32.vlgmr.msra.gmra.mxu0 %vm362_vm12, %v2126_v55  ;;  %626 = vmatpush.xpose.msra.mxu2 %v534_v17 }
 0x2c7   :  { %574 = vmatpush.msra.mxu0 %v518_v56 }
 0x2c9   :  { %575 = vmatpush.msra.mxu0 %v516_v36 }
 0x2ca   :  { %627 = vmatpush.xpose.msra.mxu2 %v532_v19 }
 0x2cb   :  { %576 = vmatpush.msra.mxu0 %v514_v45 }
 0x2cd   :  { %577 = vmatpush.msra.mxu0 %v512_v57  ;;  %v539_v57 = vperm.slane %v1711_v52, 1 }
 0x2ce   :  { %628 = vmatpush.xpose.msra.mxu2 %v530_v42  ;;  %v712_v42 = vld [vmem:[#allocation2 + $0x30] sm:$0xff] }
 0x2cf   :  { %578 = vmatpush.msra.mxu0 %v510_v58 }
 0x2d1   :  { %579 = vmatpush.msra.mxu0 %v508_v59 }
 0x2d2   :  { %629 = vmatpush.xpose.msra.mxu2 %v528_v44  ;;  %v711_v44 = vld [vmem:[#allocation2 + $0x28] sm:$0xff] }
 0x2d3   :  { %580 = vmatpush.msra.mxu0 %v506_v60 }
 0x2d5   :  { %581 = vmatpush.msra.mxu0 %v504_v61 }
 0x2d6   :  { %630 = vmatpush.xpose.msra.mxu2 %v526_v47  ;;  %v709_v47 = vld [vmem:[#allocation2 + $0x18] sm:$0xff] }
 0x2da   :  { %631 = vmatpush.xpose.msra.mxu2 %v524_v49  ;;  %v707_v49 = vld [vmem:[#allocation2 + $0x8] sm:$0xff] }
 0x2de   :  { %632 = vmatpush.xpose.msra.mxu2 %v522_v50  ;;  %v706_v50 = vld [vmem:[#allocation2] sm:$0xff] }
 0x2e2   :  { %633 = vmatpush.xpose.msra.mxu2 %v520_v51 }
 0x31f   :  { %v543_v4 = vpop.permute.xlu2 %542 }
 0x320   :  { %1712 = vmatmul.msk.f32.vlgmr.msrb.gmra.mxu0 %vm362_vm12, %v543_v4 }
 0x328   :  { %1713 = vmatmul.msk.f32.vlgmr.msra.gmra.mxu0 %vm362_vm12, %v543_v4 }
 0x343   :  { %v448_v23 = vpop.f32.mrf.mxu0 }
 0x344   :  { %v449_v25 = vadd.f32 %v448_v23, %v405_v22 }
 0x346   :  { %v454_v27 = vmin.f32 %v449_v25, 0.0  ;;  %vm452_vm13 = vcmp.gt.f32.partialorder %v449_v25, 0.0 }
 0x348   :  { %v457_v28 = vmul.f32 1.442695, %v454_v27  ;;  %v428_v29 = vpop.f32.mrf.mxu2 }
 0x349   :  { %v429_v30 = vadd.f32 %v428_v29, %v404_v26  ;;  %v721_v29 = vld [vmem:[#allocation2 + $0x78] sm:$0xff] }
 0x34a   :  { %1788 = vpow2.f32 %v457_v28  ;;  %724 = vmatpush.msrb.mxu0 %v721_v29 }
 0x34b   :  { %v453_v31 = vmin.f32 %v429_v30, 0.0  ;;  %vm451_vm14 = vcmp.gt.f32.partialorder %v429_v30, 0.0 }
 0x34d   :  { %v455_v33 = vmul.f32 1.442695, %v453_v31  ;;  %v719_v31 = vld [vmem:[#allocation2 + $0x68] sm:$0xff] }
 0x34f   :  { %1790 = vpow2.f32 %v455_v33  ;;  %v718_v33 = vld [vmem:[#allocation2 + $0x60] sm:$0xff] }
 0x350   :  { %v1789_v34 = vpop.eup %1788 }
 0x351   :  { %v1710_v35 = vadd.f32 -1.0, %v1789_v34  ;;  %v717_v34 = vld [vmem:[#allocation2 + $0x58] sm:$0xff] }
 0x353   :  { %v462_v37 = vsel %vm452_vm13, %v449_v25, %v1710_v35  ;;  %v716_v35 = vld [vmem:[#allocation2 + $0x50] sm:$0xff] }
 0x354   :  { %499 = vmatmul.f32.vlgmr.msrb.gmra.mxu2 %v462_v37  ;;  %v715_v37 = vld [vmem:[#allocation2 + $0x48] sm:$0xff] }
 0x355   :  { %v1791_v38 = vpop.eup %1790 }
 0x356   :  { %v1709_v39 = vadd.f32 -1.0, %v1791_v38 }
 0x358   :  { %v461_v40 = vsel %vm451_vm14, %v429_v30, %v1709_v39  ;;  %v720_v30 = vld [vmem:[#allocation2 + $0x70] sm:$0xff]  ;;  %v714_v39 = vld [vmem:[#allocation2 + $0x40] sm:$0xff] }
 0x359   :  { %479 = vmatmul.f32.vlgmr.msrb.gmra.mxu1 %v461_v40  ;;  %725 = vmatpush.msrb.mxu0 %v720_v30  ;;  %v818_v30 = vld [vmem:[#allocation5 + $0x170] sm:$0xff] }
 0x35a   :  { %854 = vmatpush.msrb.mxu3 %v818_v30  ;;  %v829_v30 = vld [vmem:[#allocation5 + $0x1c8] sm:$0xff] }
 0x35b   :  { %726 = vmatpush.msrb.mxu0 %v719_v31  ;;  %v819_v31 = vld [vmem:[#allocation5 + $0x178] sm:$0xff] }
 0x35c   :  { %874 = vmatpush.msrb.mxu1 %v819_v31  ;;  %v830_v31 = vld [vmem:[#allocation5 + $0x1d0] sm:$0xff] }
 0x35d   :  { %727 = vmatpush.msrb.mxu0 %v718_v33  ;;  %v816_v33 = vld [vmem:[#allocation5 + $0x160] sm:$0xff] }
 0x35e   :  { %855 = vmatpush.msrb.mxu3 %v816_v33  ;;  %v827_v33 = vld [vmem:[#allocation5 + $0x1b8] sm:$0xff] }
 0x35f   :  { %728 = vmatpush.msrb.mxu0 %v717_v34  ;;  %v817_v34 = vld [vmem:[#allocation5 + $0x168] sm:$0xff] }
 0x360   :  { %875 = vmatpush.msrb.mxu1 %v817_v34  ;;  %v828_v34 = vld [vmem:[#allocation5 + $0x1c0] sm:$0xff] }
 0x361   :  { %729 = vmatpush.msrb.mxu0 %v716_v35 }
 0x363   :  { %730 = vmatpush.msrb.mxu0 %v715_v37  ;;  %v814_v37 = vld [vmem:[#allocation5 + $0x150] sm:$0xff] }
 0x364   :  { %856 = vmatpush.msrb.mxu3 %v814_v37  ;;  %v826_v37 = vld [vmem:[#allocation5 + $0x1b0] sm:$0xff] }
 0x365   :  { %731 = vmatpush.msrb.mxu0 %v714_v39  ;;  %v812_v39 = vld [vmem:[#allocation5 + $0x140] sm:$0xff] }
 0x366   :  { %857 = vmatpush.msrb.mxu3 %v812_v39  ;;  %v824_v39 = vld [vmem:[#allocation5 + $0x1a0] sm:$0xff] }
 0x367   :  { %732 = vmatpush.msrb.mxu0 %v713_v41  ;;  %v810_v41 = vld [vmem:[#allocation5 + $0x130] sm:$0xff] }
 0x368   :  { %858 = vmatpush.msrb.mxu3 %v810_v41  ;;  %v822_v41 = vld [vmem:[#allocation5 + $0x190] sm:$0xff] }
 0x369   :  { %733 = vmatpush.msrb.mxu0 %v712_v42  ;;  %v811_v42 = vld [vmem:[#allocation5 + $0x138] sm:$0xff] }
 0x36b   :  { %734 = vmatpush.msrb.mxu0 %v711_v44  ;;  %v809_v44 = vld [vmem:[#allocation5 + $0x128] sm:$0xff] }
 0x36d   :  { %735 = vmatpush.msrb.mxu0 %v710_v46  ;;  %v806_v46 = vld [vmem:[#allocation5 + $0x110] sm:$0xff] }
 0x36f   :  { %736 = vmatpush.msrb.mxu0 %v709_v47  ;;  %v807_v47 = vld [vmem:[#allocation5 + $0x118] sm:$0xff] }
 0x371   :  { %737 = vmatpush.msrb.mxu0 %v708_v48  ;;  %v804_v48 = vld [vmem:[#allocation5 + $0x100] sm:$0xff] }
 0x373   :  { %738 = vmatpush.msrb.mxu0 %v707_v49  ;;  %v805_v49 = vld [vmem:[#allocation5 + $0x108] sm:$0xff] }
 0x375   :  { %739 = vmatpush.msrb.mxu0 %v706_v50 }
 0x39d   :  { %v563_v54 = vpop.f32.mrf.mxu0 }
 0x39e   :  { %v564_v56 = vadd.f32 %v563_v54, %v538_v53 }
 0x3a0   :  { %v588_v36 = vmin.f32 %v564_v56, 0.0  ;;  %vm586_vm15 = vcmp.gt.f32.partialorder %v564_v56, 0.0 }
 0x3a2   :  { %v590_v45 = vmul.f32 1.442695, %v588_v36 }
 0x3a4   :  { %1792 = vpow2.f32 %v590_v45 }
 0x3a5   :  { %v583_v58 = vpop.f32.mrf.mxu0 }
 0x3a6   :  { %v584_v59 = vadd.f32 %v583_v58, %v539_v57 }
 0x3a8   :  { %v589_v60 = vmin.f32 %v584_v59, 0.0  ;;  %vm587_vm0 = vcmp.gt.f32.partialorder %v584_v59, 0.0 }
 0x3aa   :  { %v1793_v61 = vpop.eup %1792  ;;  %v592_v62 = vmul.f32 1.442695, %v589_v60 }
 0x3ab   :  { %v1714_v63 = vadd.f32 -1.0, %v1793_v61 }
 0x3ac   :  { %1794 = vpow2.f32 %v592_v62 }
 0x3ad   :  { %v596_v0 = vsel %vm586_vm15, %v564_v56, %v1714_v63 }
 0x3ae   :  { %614 = vmatmul.f32.vlgmr.msra.gmra.mxu1 %v596_v0 }
 0x3b2   :  { %v1795_v1 = vpop.eup %1794 }
 0x3b3   :  { %v1715_v2 = vadd.f32 -1.0, %v1795_v1 }
 0x3b5   :  { %v597_v3 = vsel %vm587_vm0, %v584_v59, %v1715_v2 }
 0x3b6   :  { %634 = vmatmul.f32.vlgmr.msra.gmra.mxu2 %v597_v3  ;;  %v1763_v3 = vld [vmem:[%s2369_s7 + $0x4] ss:$0 sm:$0xff] }
 0x3d6   :  { %v480_v4 = vpop.f32.mrf.mxu1 }
 0x3d7   :  { %v500_v5 = vpop.f32.mrf.mxu2 }
 0x3d8   :  { %v501_v10 = vadd.f32 %v500_v5, %v480_v4 }
 0x42b   :  { %v615_v6 = vpop.f32.mrf.mxu1 }
 0x439   :  { %v635_v7 = vpop.f32.mrf.mxu2 }
 0x43a   :  { %v636_v8 = vadd.f32 %v635_v7, %v615_v6  ;;  %v1764_v6 = vld [vmem:[%s2369_s7 + $0x5] ss:$0 sm:$0xff] }
 0x43c   :  { %639 = vrot.lane.b32.xlu1 %v636_v8, %s1920_s13 }
 0x4ae   :  { %v640_v11 = vpop.permute.xlu1 %639 }
 0x4af   :  { %v642_v12 = vsel %vm362_vm12, %v501_v10, %v640_v11  ;;  %v1765_v10 = vld [vmem:[%s2369_s7 + $0x6] ss:$0 sm:$0xff] }
 0x4b0   :  { %v645_v13 = vadd.f32 %v1762_v9, %v642_v12 }
 0x4b2   :  { %v646_v14 = vadd.f32 %v645_v13, %v2126_v55 }
 0x4b4   :  { %670 = vrot.lane.b32.xlu2 %v646_v14, %s1920_s13  ;;  %v647_v16 = vsel %vm302_vm1, %v646_v14, 0.0 }
 0x4dd   :  { %648 = vadd.xlane.f32.xlu2 %v647_v16 }
 0x50e   :  { %v671_v17 = vpop.permute.xlu2 %670 }
 0x50f   :  { %v673_v18 = vsel %vm302_vm1, %v671_v17, 0.0 }
 0x510   :  { %674 = vadd.xlane.f32.xlu1 %v673_v18 }
 0x550   :  { %v649_v55 = vpop.xlane.xlu2 %648 }
 0x551   :  { %v650_v23 = vmul.f32 %v649_v55, %v2071_v32 }
 0x553   :  { %v2160_v24 = vsub.f32 %v646_v14, %v650_v23 }
 0x555   :  { %v652_v25 = vmul.f32 %v2160_v24, %v2160_v24 }
 0x557   :  { %v653_v26 = vsel %vm302_vm1, %v652_v25, 0.0 }
 0x583   :  { %v675_v19 = vpop.xlane.xlu1 %674 }
 0x584   :  { %v676_v20 = vmul.f32 %v675_v19, %v2071_v32 }
 0x586   :  { %v2154_v21 = vsub.f32 %v646_v14, %v676_v20 }
 0x588   :  { %v678_v22 = vmul.f32 %v2154_v21, %v2154_v21 }
 0x58a   :  { %680 = vrot.lane.b32.xlu0 %v678_v22, %s1920_s13 }
 0x5b4   :  { %654 = vadd.xlane.f32.xlu0 %v653_v26 }
 0x5fc   :  { %v681_v27 = vpop.permute.xlu0 %680 }
 0x5fd   :  { %v683_v28 = vsel %vm302_vm1, %v681_v27, 0.0 }
 0x5fe   :  { %684 = vadd.xlane.f32.xlu1 %v683_v28 }
 0x627   :  { %v655_v38 = vpop.xlane.xlu0 %654 }
 0x628   :  { %v656_v40 = vmul.f32 %v655_v38, %v2071_v32  ;;  %v815_v38 = vld [vmem:[#allocation5 + $0x158] sm:$0xff] }
 0x629   :  { %876 = vmatpush.msrb.mxu1 %v815_v38  ;;  %v823_v38 = vld [vmem:[#allocation5 + $0x198] sm:$0xff] }
 0x62a   :  { %v657_v43 = vadd.f32 1e-05, %v656_v40  ;;  %v813_v40 = vld [vmem:[#allocation5 + $0x148] sm:$0xff] }
 0x62b   :  { %877 = vmatpush.msrb.mxu1 %v813_v40  ;;  %v821_v40 = vld [vmem:[#allocation5 + $0x188] sm:$0xff] }
 0x62c   :  { %1796 = vrsqrt.f32 %v657_v43  ;;  %vm664_vm3 = vweird.f32 %v657_v43 }
 0x62d   :  { %878 = vmatpush.msrb.mxu1 %v811_v42  ;;  %v820_v42 = vld [vmem:[#allocation5 + $0x180] sm:$0xff] }
 0x62f   :  { %879 = vmatpush.msrb.mxu1 %v809_v44  ;;  %v968_v44 = vld [vmem:[#allocation5 + $0x4f0] sm:$0xff] }
 0x631   :  { %880 = vmatpush.msrb.mxu1 %v807_v47  ;;  %v966_v47 = vld [vmem:[#allocation5 + $0x4e0] sm:$0xff] }
 0x632   :  { %v1797_v51 = vpop.eup %1796 }
 0x633   :  { %v659_v52 = vmul.f32 %v1797_v51, %v657_v43  ;;  %vm665_vm2 = vweird.f32 %v1797_v51  ;;  %v808_v43 = vld [vmem:[#allocation5 + $0x120] sm:$0xff]  ;;  %881 = vmatpush.msrb.mxu1 %v805_v49 }
 0x634   :  { %vm666_vm5 = vmor %vm664_vm3, %vm665_vm2  ;;  %859 = vmatpush.msrb.mxu3 %v808_v43  ;;  %v1716_v49 = vld [vmem:[%s2370_s8 + $0x1] ss:$8 sm:$0x3] }
 0x635   :  { %v660_v36 = vmul.f32 %v1797_v51, %v659_v52  ;;  %v953_v52 = vld [vmem:[#allocation5 + $0x478] sm:$0xff] }
 0x636   :  { %860 = vmatpush.msrb.mxu3 %v806_v46  ;;  %1009 = vmatpush.msra.mxu1 %v953_v52  ;;  %v969_v46 = vld [vmem:[#allocation5 + $0x4f8] sm:$0xff]  ;;  %v840_v52 = vperm.slane %v1716_v49, 1 }
 0x637   :  { %v661_v45 = vmul.f32 0.5, %v660_v36  ;;  %v951_v36 = vld [vmem:[#allocation5 + $0x468] sm:$0xff] }
 0x638   :  { %861 = vmatpush.msrb.mxu3 %v804_v48  ;;  %1010 = vmatpush.msra.mxu1 %v951_v36  ;;  %v967_v48 = vld [vmem:[#allocation5 + $0x4e8] sm:$0xff] }
 0x639   :  { %v662_v58 = vsub.f32 1.5, %v661_v45 }
 0x63b   :  { %v663_v61 = vmul.f32 %v1797_v51, %v662_v58  ;;  %v949_v58 = vld [vmem:[#allocation5 + $0x458] sm:$0xff] }
 0x63c   :  { %1011 = vmatpush.msra.mxu1 %v949_v58 }
 0x63d   :  { %v667_v0 = vsel %vm666_vm5, %v1797_v51, %v663_v61  ;;  %v952_v51 = vld [vmem:[#allocation5 + $0x470] sm:$0xff]  ;;  %v947_v61 = vld [vmem:[#allocation5 + $0x448] sm:$0xff] }
 0x63e   :  { %v668_v4 = vmul.f32 %v667_v0, %v2160_v24  ;;  %989 = vmatpush.msra.mxu0 %v952_v51  ;;  %v944_v0 = vld [vmem:[#allocation5 + $0x430] sm:$0xff]  ;;  %1012 = vmatpush.msra.mxu1 %v947_v61  ;;  %v965_v51 = vld [vmem:[#allocation5 + $0x4d8] sm:$0xff] }
 0x671   :  { %v685_v53 = vpop.xlane.xlu1 %684 }
 0x672   :  { %v686_v54 = vmul.f32 %v685_v53, %v2071_v32  ;;  %v950_v53 = vld [vmem:[#allocation5 + $0x460] sm:$0xff] }
 0x673   :  { %990 = vmatpush.msra.mxu0 %v950_v53 }
 0x674   :  { %v687_v56 = vadd.f32 1e-05, %v686_v54 }
 0x676   :  { %1798 = vrsqrt.f32 %v687_v56  ;;  %vm694_vm6 = vweird.f32 %v687_v56 }
 0x67c   :  { %v1799_v57 = vpop.eup %1798 }
 0x67d   :  { %v689_v59 = vmul.f32 %v1799_v57, %v687_v56  ;;  %vm695_vm4 = vweird.f32 %v1799_v57 }
 0x67e   :  { %vm696_vm7 = vmor %vm694_vm6, %vm695_vm4 }
 0x67f   :  { %v690_v60 = vmul.f32 %v1799_v57, %v689_v59 }
 0x681   :  { %v691_v62 = vmul.f32 0.5, %v690_v60  ;;  %v946_v60 = vld [vmem:[#allocation5 + $0x440] sm:$0xff] }
 0x683   :  { %v692_v63 = vsub.f32 1.5, %v691_v62  ;;  %v835_v62 = vld [vmem:[#allocation5 + $0x1f8] sm:$0xff] }
 0x684   :  { %926 = vmatpush.xpose.msrb.mxu2 %v835_v62 }
 0x685   :  { %v693_v1 = vmul.f32 %v1799_v57, %v692_v63 }
 0x687   :  { %v697_v2 = vsel %vm696_vm7, %v1799_v57, %v693_v1  ;;  %v948_v57 = vld [vmem:[#allocation5 + $0x450] sm:$0xff]  ;;  %v945_v1 = vld [vmem:[#allocation5 + $0x438] sm:$0xff] }
 0x688   :  { %v698_v5 = vmul.f32 %v697_v2, %v2154_v21  ;;  %991 = vmatpush.msra.mxu0 %v948_v57  ;;  %v942_v2 = vld [vmem:[#allocation5 + $0x420] sm:$0xff]  ;;  %1013 = vmatpush.msra.mxu1 %v945_v1 }
 0x68a   :  { %v699_v7 = vsel %vm362_vm12, %v668_v4, %v698_v5  ;;  %992 = vmatpush.msra.mxu0 %v946_v60  ;;  %v940_v5 = vld [vmem:[#allocation5 + $0x410] sm:$0xff] }
 0x68b   :  { %v702_v8 = vmul.f32 %v1763_v3, %v699_v7  ;;  %v943_v3 = vld [vmem:[#allocation5 + $0x428] sm:$0xff] }
 0x68c   :  { %993 = vmatpush.msra.mxu0 %v944_v0  ;;  %1014 = vmatpush.msra.mxu1 %v943_v3 }
 0x68d   :  { %v705_v9 = vadd.f32 %v1764_v6, %v702_v8  ;;  %v941_v6 = vld [vmem:[#allocation5 + $0x418] sm:$0xff]  ;;  %v938_v8 = vld [vmem:[#allocation5 + $0x400] sm:$0xff] }
 0x68e   :  { %994 = vmatpush.msra.mxu0 %v942_v2  ;;  %1015 = vmatpush.msra.mxu1 %v941_v6  ;;  %v961_v6 = vld [vmem:[#allocation5 + $0x4b8] sm:$0xff] }
 0x68f   :  { %740 = vmatmul.f32.vlgmr.msrb.gmra.mxu0 %v705_v9 }
 0x690   :  { %995 = vmatpush.msra.mxu0 %v940_v5  ;;  %v960_v5 = vld [vmem:[#allocation5 + $0x4b0] sm:$0xff] }
 0x692   :  { %996 = vmatpush.msra.mxu0 %v938_v8  ;;  %v959_v8 = vld [vmem:[#allocation5 + $0x4a8] sm:$0xff] }
 0x694   :  { %1041 = vmatpush.xpose.msrb.mxu0 %v968_v44 }
 0x698   :  { %1042 = vmatpush.xpose.msrb.mxu0 %v966_v47 }
 0x70c   :  { %v741_v11 = vpop.f32.mrf.mxu0 }
 0x70d   :  { %v742_v12 = vadd.f32 %v1765_v10, %v741_v11 }
 0x70f   :  { %v744_v13 = vadd.f32 %v742_v12, %v705_v9  ;;  %v939_v9 = vld [vmem:[#allocation5 + $0x408] sm:$0xff] }
 0x710   :  { %1016 = vmatpush.msra.mxu1 %v939_v9  ;;  %v956_v9 = vld [vmem:[#allocation5 + $0x490] sm:$0xff] }
 0x711   :  { %768 = vrot.lane.b32.xlu2 %v744_v13, %s1920_s13  ;;  %v745_v17 = vsel %vm302_vm1, %v744_v13, 0.0 }
 0x76b   :  { %v769_v14 = vpop.permute.xlu2 %768 }
 0x76c   :  { %v771_v16 = vsel %vm302_vm1, %v769_v14, 0.0 }
 0x76d   :  { %772 = vadd.xlane.f32.xlu1 %v771_v16 }
 0x775   :  { %746 = vadd.xlane.f32.xlu1 %v745_v17 }
 0x7e0   :  { %v773_v18 = vpop.xlane.xlu1 %772 }
 0x7e1   :  { %v774_v19 = vmul.f32 %v773_v18, %v2071_v32 }
 0x7e3   :  { %v2184_v20 = vsub.f32 %v744_v13, %v774_v19 }
 0x7e5   :  { %v776_v21 = vmul.f32 %v2184_v20, %v2184_v20 }
 0x7e7   :  { %778 = vrot.lane.b32.xlu1 %v776_v21, %s1920_s13  ;;  %v1766_v21 = vld [vmem:[%s2369_s7 + $0x7] ss:$0 sm:$0xff] }
 0x7e8   :  { %v747_v22 = vpop.xlane.xlu1 %746 }
 0x7e9   :  { %v748_v55 = vmul.f32 %v747_v22, %v2071_v32 }
 0x7eb   :  { %v2190_v23 = vsub.f32 %v744_v13, %v748_v55 }
 0x7ed   :  { %v750_v24 = vmul.f32 %v2190_v23, %v2190_v23 }
 0x7ef   :  { %v751_v25 = vsel %vm302_vm1, %v750_v24, 0.0  ;;  %v1767_v24 = vld [vmem:[%s2369_s7 + $0x8] ss:$0 sm:$0xff] }
 0x7f0   :  { %752 = vadd.xlane.f32.xlu0 %v751_v25 }
 0x859   :  { %v779_v26 = vpop.permute.xlu1 %778 }
 0x85a   :  { %v781_v27 = vsel %vm302_vm1, %v779_v26, 0.0 }
 0x85b   :  { %782 = vadd.xlane.f32.xlu2 %v781_v27 }
 0x863   :  { %v753_v28 = vpop.xlane.xlu0 %752 }
 0x864   :  { %v754_v29 = vmul.f32 %v753_v28, %v2071_v32  ;;  %v831_v28 = vld [vmem:[#allocation5 + $0x1d8] sm:$0xff] }
 0x866   :  { %v2197_v35 = vadd.f32 1e-05, %v754_v29  ;;  %v832_v29 = vld [vmem:[#allocation5 + $0x1e0] sm:$0xff] }
 0x868   :  { %1800 = vrsqrt.f32 %v2197_v35  ;;  %vm762_vm9 = vweird.f32 %v2197_v35 }
 0x86e   :  { %v1801_v50 = vpop.eup %1800 }
 0x86f   :  { %v757_v54 = vmul.f32 %v1801_v50, %v2197_v35  ;;  %vm763_vm8 = vweird.f32 %v1801_v50  ;;  %v825_v35 = vld [vmem:[#allocation5 + $0x1a8] sm:$0xff] }
 0x870   :  { %vm764_vm11 = vmor %vm762_vm9, %vm763_vm8 }
 0x871   :  { %v758_v63 = vmul.f32 %v1801_v50, %v757_v54  ;;  %v962_v54 = vld [vmem:[#allocation5 + $0x4c0] sm:$0xff] }
 0x873   :  { %v759_v4 = vmul.f32 0.5, %v758_v63 }
 0x875   :  { %v760_v10 = vsub.f32 1.5, %v759_v4 }
 0x877   :  { %v761_v13 = vmul.f32 %v1801_v50, %v760_v10  ;;  %v957_v10 = vld [vmem:[#allocation5 + $0x498] sm:$0xff] }
 0x879   :  { %v765_v17 = vsel %vm764_vm11, %v1801_v50, %v761_v13  ;;  %v964_v50 = vld [vmem:[#allocation5 + $0x4d0] sm:$0xff]  ;;  %v1721_v13 = vld [vmem:[%s2370_s8 + $0x4] ss:$8 sm:$0x3] }
 0x87a   :  { %v766_v22 = vmul.f32 %v765_v17, %v2190_v23  ;;  %v833_v23 = vld [vmem:[#allocation5 + $0x1e8] sm:$0xff]  ;;  %1043 = vmatpush.xpose.msrb.mxu0 %v964_v50 }
 0x87b   :  { %927 = vmatpush.xpose.msrb.mxu2 %v833_v23 }
 0x87e   :  { %1044 = vmatpush.xpose.msrb.mxu0 %v962_v54 }
 0x87f   :  { %928 = vmatpush.xpose.msrb.mxu2 %v831_v28 }
 0x882   :  { %1045 = vmatpush.xpose.msrb.mxu0 %v960_v5  ;;  %v1146_v5 = vld [vmem:[#allocation2 + $0xa8] sm:$0xff] }
 0x883   :  { %929 = vmatpush.xpose.msrb.mxu2 %v829_v30 }
 0x887   :  { %930 = vmatpush.xpose.msrb.mxu2 %v827_v33 }
 0x88b   :  { %931 = vmatpush.xpose.msrb.mxu2 %v825_v35 }
 0x88f   :  { %932 = vmatpush.xpose.msrb.mxu2 %v823_v38  ;;  %v1768_v38 = vld [vmem:[%s2369_s7 + $0x9] ss:$0 sm:$0xff] }
 0x893   :  { %933 = vmatpush.xpose.msrb.mxu2 %v821_v40 }
 0x8ce   :  { %v783_v56 = vpop.xlane.xlu2 %782 }
 0x8cf   :  { %v784_v45 = vmul.f32 %v783_v56, %v2071_v32  ;;  %v963_v56 = vld [vmem:[#allocation5 + $0x4c8] sm:$0xff] }
 0x8d1   :  { %v785_v59 = vadd.f32 1e-05, %v784_v45  ;;  %v839_v45 = vperm.slane %v1716_v49, 0 }
 0x8d3   :  { %1802 = vrsqrt.f32 %v785_v59  ;;  %vm792_vm13 = vweird.f32 %v785_v59 }
 0x8d9   :  { %v1803_v7 = vpop.eup %1802 }
 0x8da   :  { %v787_v11 = vmul.f32 %v1803_v7, %v785_v59  ;;  %vm793_vm10 = vweird.f32 %v1803_v7 }
 0x8db   :  { %vm794_vm14 = vmor %vm792_vm13, %vm793_vm10 }
 0x8dc   :  { %v788_v12 = vmul.f32 %v1803_v7, %v787_v11  ;;  %v954_v11 = vld [vmem:[#allocation5 + $0x480] sm:$0xff] }
 0x8de   :  { %v789_v14 = vmul.f32 0.5, %v788_v12  ;;  %v955_v12 = vld [vmem:[#allocation5 + $0x488] sm:$0xff] }
 0x8e0   :  { %v790_v16 = vsub.f32 1.5, %v789_v14  ;;  %v973_v14 = vperm.slane %v1721_v13, 0 }
 0x8e2   :  { %v791_v18 = vmul.f32 %v1803_v7, %v790_v16  ;;  %v974_v16 = vperm.slane %v1721_v13, 1 }
 0x8e4   :  { %v795_v19 = vsel %vm794_vm14, %v1803_v7, %v791_v18  ;;  %v958_v7 = vld [vmem:[#allocation5 + $0x4a0] sm:$0xff] }
 0x8e5   :  { %v796_v55 = vmul.f32 %v795_v19, %v2184_v20  ;;  %v834_v20 = vld [vmem:[#allocation5 + $0x1f0] sm:$0xff]  ;;  %1046 = vmatpush.xpose.msrb.mxu0 %v958_v7  ;;  %v1145_v7 = vld [vmem:[#allocation2 + $0xa0] sm:$0xff] }
 0x8e6   :  { %906 = vmatpush.xpose.msra.mxu3 %v834_v20 }
 0x8e7   :  { %v797_v25 = vsel %vm362_vm12, %v766_v22, %v796_v55 }
 0x8e8   :  { %v800_v26 = vmul.f32 %v1766_v21, %v797_v25 }
 0x8e9   :  { %1047 = vmatpush.xpose.msrb.mxu0 %v956_v9  ;;  %v1143_v9 = vld [vmem:[#allocation2 + $0x90] sm:$0xff] }
 0x8ea   :  { %v2212_v27 = vadd.f32 %v1767_v24, %v800_v26  ;;  %907 = vmatpush.xpose.msra.mxu3 %v832_v29 }
 0x8ec   :  { %977 = vrot.lane.b32.xlu0 %v2212_v27, %s1920_s13  ;;  %1717 = vmatmul.msk.f32.vlgmr.msrb.gmra.mxu3 %vm362_vm12, %v2212_v27 }
 0x8ed   :  { %1718 = vmatmul.msk.f32.vlgmr.msrb.gmra.mxu1 %vm362_vm12, %v2212_v27  ;;  %1048 = vmatpush.xpose.msrb.mxu0 %v954_v11  ;;  %v1141_v11 = vld [vmem:[#allocation2 + $0x80] sm:$0xff] }
 0x8ee   :  { %908 = vmatpush.xpose.msra.mxu3 %v830_v31  ;;  %1061 = vmatpush.xpose.msrb.mxu1 %v969_v46 }
 0x8f2   :  { %909 = vmatpush.xpose.msra.mxu3 %v828_v34  ;;  %1062 = vmatpush.xpose.msrb.mxu1 %v967_v48 }
 0x8f6   :  { %910 = vmatpush.xpose.msra.mxu3 %v826_v37  ;;  %1063 = vmatpush.xpose.msrb.mxu1 %v965_v51 }
 0x8fa   :  { %911 = vmatpush.xpose.msra.mxu3 %v824_v39  ;;  %1064 = vmatpush.xpose.msrb.mxu1 %v963_v56 }
 0x8fe   :  { %912 = vmatpush.xpose.msra.mxu3 %v822_v41  ;;  %1065 = vmatpush.xpose.msrb.mxu1 %v961_v6 }
 0x902   :  { %913 = vmatpush.xpose.msra.mxu3 %v820_v42  ;;  %1066 = vmatpush.xpose.msrb.mxu1 %v959_v8  ;;  %v1144_v8 = vld [vmem:[#allocation2 + $0x98] sm:$0xff] }
 0x906   :  { %1067 = vmatpush.xpose.msrb.mxu1 %v957_v10  ;;  %v1142_v10 = vld [vmem:[#allocation2 + $0x88] sm:$0xff] }
 0x90a   :  { %1068 = vmatpush.xpose.msrb.mxu1 %v955_v12 }
 0x95e   :  { %v978_v43 = vpop.permute.xlu0 %977 }
 0x95f   :  { %1722 = vmatmul.msk.f32.vlgmr.msra.gmra.mxu0 %vm362_vm12, %v978_v43  ;;  %1723 = vmatmul.msk.f32.vlgmr.msra.gmra.mxu1 %vm362_vm12, %v978_v43 }
 0x96a   :  { %v883_v53 = vpop.f32.mrf.mxu1 }
 0x96b   :  { %v884_v36 = vadd.f32 %v883_v53, %v840_v52 }
 0x96d   :  { %v889_v57 = vmin.f32 %v884_v36, 0.0  ;;  %vm887_vm15 = vcmp.gt.f32.partialorder %v884_v36, 0.0 }
 0x96f   :  { %v892_v58 = vmul.f32 1.442695, %v889_v57  ;;  %v863_v59 = vpop.f32.mrf.mxu3  ;;  %v1156_v57 = vld [vmem:[#allocation2 + $0xf8] sm:$0xff] }
 0x970   :  { %v864_v60 = vadd.f32 %v863_v59, %v839_v45  ;;  %1159 = vmatpush.msrb.mxu3 %v1156_v57  ;;  %v1154_v59 = vld [vmem:[#allocation2 + $0xe8] sm:$0xff]  ;;  %v1248_v57 = vld [vmem:[#allocation5 + $0x250] sm:$0xff] }
 0x971   :  { %1804 = vpow2.f32 %v892_v58  ;;  %v1155_v58 = vld [vmem:[#allocation2 + $0xf0] sm:$0xff] }
 0x972   :  { %v888_v61 = vmin.f32 %v864_v60, 0.0  ;;  %vm886_vm0 = vcmp.gt.f32.partialorder %v864_v60, 0.0  ;;  %1160 = vmatpush.msrb.mxu3 %v1155_v58 }
 0x974   :  { %v890_v62 = vmul.f32 1.442695, %v888_v61  ;;  %1161 = vmatpush.msrb.mxu3 %v1154_v59  ;;  %v1152_v61 = vld [vmem:[#allocation2 + $0xd8] sm:$0xff]  ;;  %v1246_v59 = vld [vmem:[#allocation5 + $0x240] sm:$0xff] }
 0x976   :  { %1806 = vpow2.f32 %v890_v62  ;;  %v1151_v62 = vld [vmem:[#allocation2 + $0xd0] sm:$0xff] }
 0x977   :  { %v1805_v63 = vpop.eup %1804 }
 0x978   :  { %v1720_v0 = vadd.f32 -1.0, %v1805_v63  ;;  %v1150_v63 = vld [vmem:[#allocation2 + $0xc8] sm:$0xff] }
 0x97a   :  { %v897_v1 = vsel %vm887_vm15, %v884_v36, %v1720_v0 }
 0x97b   :  { %934 = vmatmul.f32.vlgmr.msrb.gmra.mxu2 %v897_v1  ;;  %v1149_v1 = vld [vmem:[#allocation2 + $0xc0] sm:$0xff] }
 0x97c   :  { %v1807_v2 = vpop.eup %1806 }
 0x97d   :  { %v1719_v3 = vadd.f32 -1.0, %v1807_v2  ;;  %v1148_v2 = vld [vmem:[#allocation2 + $0xb8] sm:$0xff] }
 0x97f   :  { %v896_v4 = vsel %vm886_vm0, %v864_v60, %v1719_v3  ;;  %v1153_v60 = vld [vmem:[#allocation2 + $0xe0] sm:$0xff] }
 0x980   :  { %914 = vmatmul.f32.vlgmr.msra.gmra.mxu3 %v896_v4  ;;  %v1147_v4 = vld [vmem:[#allocation2 + $0xb0] sm:$0xff] }
 0x981   :  { %1162 = vmatpush.msrb.mxu3 %v1153_v60 }
 0x983   :  { %1163 = vmatpush.msrb.mxu3 %v1152_v61  ;;  %v1244_v61 = vld [vmem:[#allocation5 + $0x230] sm:$0xff] }
 0x985   :  { %1164 = vmatpush.msrb.mxu3 %v1151_v62  ;;  %v1242_v62 = vld [vmem:[#allocation5 + $0x220] sm:$0xff] }
 0x987   :  { %1165 = vmatpush.msrb.mxu3 %v1150_v63 }
 0x989   :  { %1166 = vmatpush.msrb.mxu3 %v1149_v1  ;;  %v1238_v1 = vld [vmem:[#allocation5 + $0x200] sm:$0xff] }
 0x98b   :  { %1167 = vmatpush.msrb.mxu3 %v1148_v2  ;;  %v1253_v2 = vld [vmem:[#allocation5 + $0x278] sm:$0xff] }
 0x98d   :  { %1168 = vmatpush.msrb.mxu3 %v1147_v4  ;;  %v1249_v4 = vld [vmem:[#allocation5 + $0x258] sm:$0xff] }
 0x98f   :  { %1169 = vmatpush.msrb.mxu3 %v1146_v5  ;;  %v1247_v5 = vld [vmem:[#allocation5 + $0x248] sm:$0xff] }
 0x991   :  { %1170 = vmatpush.msrb.mxu3 %v1145_v7  ;;  %v1245_v7 = vld [vmem:[#allocation5 + $0x238] sm:$0xff] }
 0x993   :  { %1171 = vmatpush.msrb.mxu3 %v1144_v8  ;;  %v1243_v8 = vld [vmem:[#allocation5 + $0x228] sm:$0xff] }
 0x995   :  { %1172 = vmatpush.msrb.mxu3 %v1143_v9 }
 0x997   :  { %1173 = vmatpush.msrb.mxu3 %v1142_v10 }
 0x999   :  { %1174 = vmatpush.msrb.mxu3 %v1141_v11  ;;  %v1241_v11 = vld [vmem:[#allocation5 + $0x218] sm:$0xff] }
 0x9dc   :  { %v998_v17 = vpop.f32.mrf.mxu0  ;;  %v1018_v18 = vpop.f32.mrf.mxu1 }
 0x9dd   :  { %v999_v19 = vadd.f32 %v998_v17, %v973_v14  ;;  %v1019_v21 = vadd.f32 %v1018_v18, %v974_v16 }
 0x9df   :  { %v1023_v22 = vmin.f32 %v999_v19, 0.0  ;;  %v1024_v55 = vmin.f32 %v1019_v21, 0.0  ;;  %vm1021_vm2 = vcmp.gt.f32.partialorder %v999_v19, 0.0  ;;  %vm1022_vm3 = vcmp.gt.f32.partialorder %v1019_v21, 0.0 }
 0x9e1   :  { %v1025_v24 = vmul.f32 1.442695, %v1023_v22  ;;  %v1027_v25 = vmul.f32 1.442695, %v1024_v55 }
 0x9e3   :  { %1808 = vpow2.f32 %v1025_v24 }
 0x9e4   :  { %1810 = vpow2.f32 %v1027_v25 }
 0x9e9   :  { %v1809_v26 = vpop.eup %1808 }
 0x9ea   :  { %v1811_v23 = vpop.eup %1810  ;;  %v1724_v20 = vadd.f32 -1.0, %v1809_v26 }
 0x9eb   :  { %v1725_v28 = vadd.f32 -1.0, %v1811_v23 }
 0x9ec   :  { %v1031_v29 = vsel %vm1021_vm2, %v999_v19, %v1724_v20 }
 0x9ed   :  { %1049 = vmatmul.f32.vlgmr.msrb.gmra.mxu0 %v1031_v29  ;;  %v1032_v30 = vsel %vm1022_vm3, %v1019_v21, %v1725_v28 }
 0x9ee   :  { %1069 = vmatmul.f32.vlgmr.msrb.gmra.mxu1 %v1032_v30  ;;  %v1769_v30 = vld [vmem:[%s2369_s7 + $0xa] ss:$0 sm:$0xff] }
 0x9fe   :  { %v935_v37 = vpop.f32.mrf.mxu2 }
 0xa03   :  { %v915_v35 = vpop.f32.mrf.mxu3 }
 0xa04   :  { %v936_v39 = vadd.f32 %v935_v37, %v915_v35 }
 0xa6a   :  { %v1050_v31 = vpop.f32.mrf.mxu0 }
 0xa6b   :  { %v1070_v33 = vpop.f32.mrf.mxu1 }
 0xa6c   :  { %v1071_v34 = vadd.f32 %v1070_v33, %v1050_v31 }
 0xa6e   :  { %1074 = vrot.lane.b32.xlu1 %v1071_v34, %s1920_s13  ;;  %v1770_v34 = vld [vmem:[%s2369_s7 + $0xb] ss:$0 sm:$0xff] }
 0xae0   :  { %v1075_v40 = vpop.permute.xlu1 %1074 }
 0xae1   :  { %v1077_v41 = vsel %vm362_vm12, %v936_v39, %v1075_v40  ;;  %v1771_v39 = vld [vmem:[%s2369_s7 + $0xc] ss:$0 sm:$0xff] }
 0xae2   :  { %v1080_v42 = vadd.f32 %v1768_v38, %v1077_v41 }
 0xae4   :  { %v1081_v43 = vadd.f32 %v1080_v42, %v2212_v27 }
 0xae6   :  { %1105 = vrot.lane.b32.xlu0 %v1081_v43, %s1920_s13  ;;  %v1082_v44 = vsel %vm302_vm1, %v1081_v43, 0.0 }
 0xb10   :  { %1083 = vadd.xlane.f32.xlu0 %v1082_v44 }
 0xb58   :  { %v1106_v46 = vpop.permute.xlu0 %1105 }
 0xb59   :  { %v1108_v47 = vsel %vm302_vm1, %v1106_v46, 0.0 }
 0xb5a   :  { %1109 = vadd.xlane.f32.xlu1 %v1108_v47 }
 0xb83   :  { %v1084_v27 = vpop.xlane.xlu0 %1083 }
 0xb84   :  { %v1085_v52 = vmul.f32 %v1084_v27, %v2071_v32 }
 0xb86   :  { %v2244_v53 = vsub.f32 %v1081_v43, %v1085_v52 }
 0xb88   :  { %v1087_v54 = vmul.f32 %v2244_v53, %v2244_v53 }
 0xb8a   :  { %v1088_v56 = vsel %vm302_vm1, %v1087_v54, 0.0 }
 0xbcd   :  { %v1110_v48 = vpop.xlane.xlu1 %1109 }
 0xbce   :  { %v1111_v49 = vmul.f32 %v1110_v48, %v2071_v32 }
 0xbd0   :  { %v2238_v50 = vsub.f32 %v1081_v43, %v1111_v49 }
 0xbd2   :  { %v1113_v51 = vmul.f32 %v2238_v50, %v2238_v50 }
 0xbd4   :  { %1115 = vrot.lane.b32.xlu2 %v1113_v51, %s1920_s13 }
 0xbfd   :  { %1089 = vadd.xlane.f32.xlu2 %v1088_v56 }
 0xc2e   :  { %v1116_v36 = vpop.permute.xlu2 %1115 }
 0xc2f   :  { %v1118_v45 = vsel %vm302_vm1, %v1116_v36, 0.0  ;;  %v1252_v36 = vld [vmem:[#allocation5 + $0x270] sm:$0xff] }
 0xc30   :  { %1119 = vadd.xlane.f32.xlu1 %v1118_v45  ;;  %1288 = vmatpush.msra.mxu2 %v1252_v36  ;;  %v1250_v45 = vld [vmem:[#allocation5 + $0x260] sm:$0xff]  ;;  %v1267_v36 = vld [vmem:[#allocation5 + $0x2e8] sm:$0xff] }
 0xc32   :  { %1289 = vmatpush.msra.mxu2 %v1250_v45  ;;  %v1264_v45 = vld [vmem:[#allocation5 + $0x2d0] sm:$0xff] }
 0xc34   :  { %1290 = vmatpush.msra.mxu2 %v1248_v57  ;;  %v1262_v57 = vld [vmem:[#allocation5 + $0x2c0] sm:$0xff] }
 0xc36   :  { %1291 = vmatpush.msra.mxu2 %v1246_v59  ;;  %v1260_v59 = vld [vmem:[#allocation5 + $0x2b0] sm:$0xff] }
 0xc38   :  { %1292 = vmatpush.msra.mxu2 %v1244_v61  ;;  %v1258_v61 = vld [vmem:[#allocation5 + $0x2a0] sm:$0xff] }
 0xc3a   :  { %1293 = vmatpush.msra.mxu2 %v1242_v62  ;;  %v1263_v62 = vld [vmem:[#allocation5 + $0x2c8] sm:$0xff] }
 0xc70   :  { %v1090_v0 = vpop.xlane.xlu2 %1089 }
 0xc71   :  { %v1091_v3 = vmul.f32 %v1090_v0, %v2071_v32  ;;  %v1240_v0 = vld [vmem:[#allocation5 + $0x210] sm:$0xff] }
 0xc72   :  { %1294 = vmatpush.msra.mxu2 %v1240_v0  ;;  %v1261_v0 = vld [vmem:[#allocation5 + $0x2b8] sm:$0xff] }
 0xc73   :  { %v1092_v6 = vadd.f32 1e-05, %v1091_v3  ;;  %v1251_v3 = vld [vmem:[#allocation5 + $0x268] sm:$0xff] }
 0xc74   :  { %1295 = vmatpush.msra.mxu2 %v1238_v1  ;;  %v1254_v1 = vld [vmem:[#allocation5 + $0x280] sm:$0xff] }
 0xc75   :  { %1812 = vrsqrt.f32 %v1092_v6  ;;  %vm1099_vm5 = vweird.f32 %v1092_v6 }
 0xc76   :  { %1308 = vmatpush.msrb.mxu2 %v1253_v2  ;;  %v1259_v2 = vld [vmem:[#allocation5 + $0x2a8] sm:$0xff] }
 0xc78   :  { %1309 = vmatpush.msrb.mxu2 %v1251_v3  ;;  %v1257_v3 = vld [vmem:[#allocation5 + $0x298] sm:$0xff] }
 0xc7a   :  { %1310 = vmatpush.msrb.mxu2 %v1249_v4  ;;  %v1255_v4 = vld [vmem:[#allocation5 + $0x288] sm:$0xff] }
 0xc7b   :  { %v1813_v12 = vpop.eup %1812 }
 0xc7c   :  { %v1094_v13 = vmul.f32 %v1813_v12, %v1092_v6  ;;  %vm1100_vm4 = vweird.f32 %v1813_v12  ;;  %1311 = vmatpush.msrb.mxu2 %v1247_v5  ;;  %v1402_v5 = vld [vmem:[#allocation5 + $0x5f0] sm:$0xff] }
 0xc7d   :  { %vm1101_vm7 = vmor %vm1099_vm5, %vm1100_vm4 }
 0xc7e   :  { %v1095_v18 = vmul.f32 %v1813_v12, %v1094_v13  ;;  %1312 = vmatpush.msrb.mxu2 %v1245_v7  ;;  %v1239_v13 = vld [vmem:[#allocation5 + $0x208] sm:$0xff] }
 0xc7f   :  { %v1726_v7 = vld [vmem:[%s2370_s8 + $0x2] ss:$8 sm:$0x3] }
 0xc80   :  { %v1096_v19 = vmul.f32 0.5, %v1095_v18  ;;  %1313 = vmatpush.msrb.mxu2 %v1243_v8  ;;  %v1384_v18 = vld [vmem:[#allocation5 + $0x560] sm:$0xff] }
 0xc81   :  { %v1400_v8 = vld [vmem:[#allocation5 + $0x5e0] sm:$0xff] }
 0xc82   :  { %v1097_v22 = vsub.f32 1.5, %v1096_v19  ;;  %1314 = vmatpush.msrb.mxu2 %v1241_v11  ;;  %v1398_v11 = vld [vmem:[#allocation5 + $0x5d0] sm:$0xff] }
 0xc84   :  { %v1098_v25 = vmul.f32 %v1813_v12, %v1097_v22  ;;  %1315 = vmatpush.msrb.mxu2 %v1239_v13  ;;  %v1380_v22 = vld [vmem:[#allocation5 + $0x540] sm:$0xff] }
 0xc86   :  { %v1102_v20 = vsel %vm1101_vm7, %v1813_v12, %v1098_v25 }
 0xc87   :  { %v1103_v31 = vmul.f32 %v1102_v20, %v2244_v53  ;;  %v1376_v20 = vld [vmem:[#allocation5 + $0x520] sm:$0xff] }
 0xca3   :  { %v1120_v14 = vpop.xlane.xlu1 %1119 }
 0xca4   :  { %v1121_v16 = vmul.f32 %v1120_v14, %v2071_v32 }
 0xca6   :  { %v1122_v17 = vadd.f32 1e-05, %v1121_v16 }
 0xca8   :  { %1814 = vrsqrt.f32 %v1122_v17  ;;  %vm1129_vm8 = vweird.f32 %v1122_v17 }
 0xcae   :  { %v1815_v21 = vpop.eup %1814 }
 0xcaf   :  { %v1124_v55 = vmul.f32 %v1815_v21, %v1122_v17  ;;  %vm1130_vm6 = vweird.f32 %v1815_v21  ;;  %v1386_v17 = vld [vmem:[#allocation5 + $0x570] sm:$0xff] }
 0xcb0   :  { %vm1131_vm9 = vmor %vm1129_vm8, %vm1130_vm6  ;;  %1423 = vmatpush.msra.mxu3 %v1386_v17  ;;  %v1396_v17 = vld [vmem:[#allocation5 + $0x5c0] sm:$0xff]  ;;  %vm191_vm6 = vcmask 11264  }
 0xcb1   :  { %v1125_v24 = vmul.f32 %v1815_v21, %v1124_v55 }
 0xcb2   :  { %1424 = vmatpush.msra.mxu3 %v1384_v18  ;;  %v1397_v18 = vld [vmem:[#allocation5 + $0x5c8] sm:$0xff] }
 0xcb3   :  { %v1126_v26 = vmul.f32 0.5, %v1125_v24 }
 0xcb5   :  { %v1127_v23 = vsub.f32 1.5, %v1126_v26  ;;  %v1378_v26 = vld [vmem:[#allocation5 + $0x530] sm:$0xff] }
 0xcb7   :  { %v1128_v28 = vmul.f32 %v1815_v21, %v1127_v23 }
 0xcb9   :  { %v1132_v29 = vsel %vm1131_vm9, %v1815_v21, %v1128_v28  ;;  %v1382_v21 = vld [vmem:[#allocation5 + $0x550] sm:$0xff] }
 0xcba   :  { %v1133_v33 = vmul.f32 %v1132_v29, %v2238_v50  ;;  %1425 = vmatpush.msra.mxu3 %v1382_v21  ;;  %v1274_v21 = vperm.slane %v1726_v7, 1 }
 0xcbc   :  { %v1134_v35 = vsel %vm362_vm12, %v1103_v31, %v1133_v33  ;;  %1426 = vmatpush.msra.mxu3 %v1380_v22  ;;  %v1372_v33 = vld [vmem:[#allocation5 + $0x500] sm:$0xff] }
 0xcbd   :  { %v1137_v37 = vmul.f32 %v1769_v30, %v1134_v35  ;;  %v1374_v30 = vld [vmem:[#allocation5 + $0x510] sm:$0xff] }
 0xcbe   :  { %1427 = vmatpush.msra.mxu3 %v1378_v26 }
 0xcbf   :  { %v1140_v38 = vadd.f32 %v1770_v34, %v1137_v37 }
 0xcc0   :  { %1428 = vmatpush.msra.mxu3 %v1376_v20 }
 0xcc1   :  { %1175 = vmatmul.f32.vlgmr.msrb.gmra.mxu3 %v1140_v38  ;;  %v1772_v38 = vld [vmem:[%s2369_s7 + $0xd] ss:$0 sm:$0xff] }
 0xcc2   :  { %1429 = vmatpush.msra.mxu3 %v1374_v30 }
 0xcc4   :  { %1430 = vmatpush.msra.mxu3 %v1372_v33  ;;  %v1395_v33 = vld [vmem:[#allocation5 + $0x5b8] sm:$0xff] }
 0xcc6   :  { %1475 = vmatpush.xpose.msrb.mxu3 %v1402_v5 }
 0xcca   :  { %1476 = vmatpush.xpose.msrb.mxu3 %v1400_v8 }
 0xcce   :  { %1477 = vmatpush.xpose.msrb.mxu3 %v1398_v11 }
 0xcd2   :  { %1478 = vmatpush.xpose.msrb.mxu3 %v1396_v17 }
 0xd44   :  { %v1176_v40 = vpop.f32.mrf.mxu3 }
 0xd45   :  { %v1177_v41 = vadd.f32 %v1771_v39, %v1176_v40 }
 0xd47   :  { %1202 = vrot.lane.b32.xlu0 %v1177_v41, %s1920_s13  ;;  %v1179_v44 = vsel %vm302_vm1, %v1177_v41, 0.0 }
 0xdb9   :  { %v1203_v42 = vpop.permute.xlu0 %1202 }
 0xdba   :  { %v1205_v43 = vsel %vm302_vm1, %v1203_v42, 0.0 }
 0xdbb   :  { %1206 = vadd.xlane.f32.xlu1 %v1205_v43 }
 0xdc3   :  { %1180 = vadd.xlane.f32.xlu1 %v1179_v44 }
 0xe2e   :  { %v1207_v46 = vpop.xlane.xlu1 %1206 }
 0xe2f   :  { %v1208_v47 = vmul.f32 %v1207_v46, %v2071_v32  ;;  %v1387_v46 = vld [vmem:[#allocation5 + $0x578] sm:$0xff] }
 0xe31   :  { %v2268_v48 = vsub.f32 %v1177_v41, %v1208_v47  ;;  %v1385_v47 = vld [vmem:[#allocation5 + $0x568] sm:$0xff] }
 0xe33   :  { %v1210_v49 = vmul.f32 %v2268_v48, %v2268_v48 }
 0xe35   :  { %1212 = vrot.lane.b32.xlu1 %v1210_v49, %s1920_s13  ;;  %v1383_v49 = vld [vmem:[#allocation5 + $0x558] sm:$0xff] }
 0xe36   :  { %v1181_v50 = vpop.xlane.xlu1 %1180 }
 0xe37   :  { %v1182_v51 = vmul.f32 %v1181_v50, %v2071_v32  ;;  %v1379_v50 = vld [vmem:[#allocation5 + $0x538] sm:$0xff] }
 0xe39   :  { %v2274_v27 = vsub.f32 %v1177_v41, %v1182_v51  ;;  %v1773_v41 = vld [vmem:[%s2369_s7 + $0xe] ss:$0 sm:$0xff] }
 0xe3a   :  { %v1377_v51 = vld [vmem:[#allocation5 + $0x528] sm:$0xff] }
 0xe3b   :  { %v1184_v52 = vmul.f32 %v2274_v27, %v2274_v27 }
 0xe3d   :  { %v1185_v53 = vsel %vm302_vm1, %v1184_v52, 0.0  ;;  %v1373_v52 = vld [vmem:[#allocation5 + $0x508] sm:$0xff] }
 0xe3e   :  { %1186 = vadd.xlane.f32.xlu0 %v1185_v53  ;;  %v1268_v53 = vld [vmem:[#allocation5 + $0x2f0] sm:$0xff] }
 0xe3f   :  { %1340 = vmatpush.xpose.msra.mxu0 %v1268_v53 }
 0xea7   :  { %v1213_v54 = vpop.permute.xlu1 %1212 }
 0xea8   :  { %v1215_v56 = vsel %vm302_vm1, %v1213_v54, 0.0  ;;  %v1269_v54 = vld [vmem:[#allocation5 + $0x2f8] sm:$0xff] }
 0xea9   :  { %1216 = vadd.xlane.f32.xlu2 %v1215_v56  ;;  %v1266_v56 = vld [vmem:[#allocation5 + $0x2e0] sm:$0xff]  ;;  %1360 = vmatpush.xpose.msra.mxu1 %v1269_v54 }
 0xeaa   :  { %1341 = vmatpush.xpose.msra.mxu0 %v1266_v56 }
 0xead   :  { %1361 = vmatpush.xpose.msra.mxu1 %v1267_v36 }
 0xeae   :  { %1342 = vmatpush.xpose.msra.mxu0 %v1264_v45 }
 0xeb1   :  { %v1187_v58 = vpop.xlane.xlu0 %1186 }
 0xeb2   :  { %v1188_v60 = vmul.f32 %v1187_v58, %v2071_v32  ;;  %1343 = vmatpush.xpose.msra.mxu0 %v1262_v57 }
 0xeb4   :  { %v1189_v63 = vadd.f32 1e-05, %v1188_v60  ;;  %v1265_v60 = vld [vmem:[#allocation5 + $0x2d8] sm:$0xff] }
 0xeb5   :  { %1362 = vmatpush.xpose.msra.mxu1 %v1265_v60 }
 0xeb6   :  { %1816 = vrsqrt.f32 %v1189_v63  ;;  %vm1196_vm11 = vweird.f32 %v1189_v63  ;;  %1344 = vmatpush.xpose.msra.mxu0 %v1260_v59 }
 0xeb9   :  { %1363 = vmatpush.xpose.msra.mxu1 %v1263_v62 }
 0xeba   :  { %1345 = vmatpush.xpose.msra.mxu0 %v1258_v61 }
 0xebc   :  { %v1817_v6 = vpop.eup %1816 }
 0xebd   :  { %v1191_v9 = vmul.f32 %v1817_v6, %v1189_v63  ;;  %vm1197_vm10 = vweird.f32 %v1817_v6  ;;  %v1256_v63 = vld [vmem:[#allocation5 + $0x290] sm:$0xff]  ;;  %1364 = vmatpush.xpose.msra.mxu1 %v1261_v0 }
 0xebe   :  { %vm1198_vm14 = vmor %vm1196_vm11, %vm1197_vm10  ;;  %1346 = vmatpush.xpose.msra.mxu0 %v1256_v63  ;;  %v1774_v63 = vld [vmem:[%s2369_s7 + $0xf] ss:$0 sm:$0xff] }
 0xebf   :  { %v1192_v16 = vmul.f32 %v1817_v6, %v1191_v9  ;;  %v1401_v9 = vld [vmem:[#allocation5 + $0x5e8] sm:$0xff] }
 0xec1   :  { %v1193_v19 = vmul.f32 0.5, %v1192_v16  ;;  %1365 = vmatpush.xpose.msra.mxu1 %v1259_v2 }
 0xec2   :  { %1347 = vmatpush.xpose.msra.mxu0 %v1254_v1 }
 0xec3   :  { %v1194_v24 = vsub.f32 1.5, %v1193_v19 }
 0xec5   :  { %v1195_v28 = vmul.f32 %v1817_v6, %v1194_v24  ;;  %1366 = vmatpush.xpose.msra.mxu1 %v1257_v3 }
 0xec7   :  { %v1199_v34 = vsel %vm1198_vm14, %v1817_v6, %v1195_v28  ;;  %v1403_v6 = vld [vmem:[#allocation5 + $0x5f8] sm:$0xff] }
 0xec8   :  { %v1200_v39 = vmul.f32 %v1199_v34, %v2274_v27  ;;  %v1375_v27 = vld [vmem:[#allocation5 + $0x518] sm:$0xff]  ;;  %v1392_v34 = vld [vmem:[#allocation5 + $0x5a0] sm:$0xff] }
 0xec9   :  { %1367 = vmatpush.xpose.msra.mxu1 %v1255_v4 }
 0xf1c   :  { %v1217_v10 = vpop.xlane.xlu2 %1216 }
 0xf1d   :  { %v1218_v12 = vmul.f32 %v1217_v10, %v2071_v32  ;;  %v1273_v10 = vperm.slane %v1726_v7, 0 }
 0xf1f   :  { %v1219_v14 = vadd.f32 1e-05, %v1218_v12  ;;  %v1399_v12 = vld [vmem:[#allocation5 + $0x5d8] sm:$0xff] }
 0xf21   :  { %1818 = vrsqrt.f32 %v1219_v14  ;;  %vm1226_vm15 = vweird.f32 %v1219_v14 }
 0xf27   :  { %v1819_v55 = vpop.eup %1818 }
 0xf28   :  { %v1221_v25 = vmul.f32 %v1819_v55, %v1219_v14  ;;  %vm1227_vm13 = vweird.f32 %v1819_v55 }
 0xf29   :  { %vm1228_vm0 = vmor %vm1226_vm15, %vm1227_vm13 }
 0xf2a   :  { %v1222_v23 = vmul.f32 %v1819_v55, %v1221_v25 }
 0xf2c   :  { %v1223_v29 = vmul.f32 0.5, %v1222_v23 }
 0xf2e   :  { %v1224_v31 = vsub.f32 1.5, %v1223_v29 }
 0xf30   :  { %v1225_v35 = vmul.f32 %v1819_v55, %v1224_v31  ;;  %v1394_v31 = vld [vmem:[#allocation5 + $0x5b0] sm:$0xff] }
 0xf31   :  { %1479 = vmatpush.xpose.msrb.mxu3 %v1394_v31 }
 0xf32   :  { %v1229_v37 = vsel %vm1228_vm0, %v1819_v55, %v1225_v35  ;;  %v1393_v35 = vld [vmem:[#allocation5 + $0x5a8] sm:$0xff] }
 0xf33   :  { %v1230_v40 = vmul.f32 %v1229_v37, %v2268_v48  ;;  %v1381_v48 = vld [vmem:[#allocation5 + $0x548] sm:$0xff]  ;;  %v1390_v37 = vld [vmem:[#allocation5 + $0x590] sm:$0xff] }
 0xf35   :  { %v1231_v42 = vsel %vm362_vm12, %v1200_v39, %v1230_v40  ;;  %1480 = vmatpush.xpose.msrb.mxu3 %v1392_v34  ;;  %v1388_v39 = vld [vmem:[#allocation5 + $0x580] sm:$0xff]  ;;  %v1389_v40 = vld [vmem:[#allocation5 + $0x588] sm:$0xff] }
 0xf36   :  { %v1234_v43 = vmul.f32 %v1772_v38, %v1231_v42  ;;  %v1391_v38 = vld [vmem:[#allocation5 + $0x598] sm:$0xff] }
 0xf38   :  { %v2291_v44 = vadd.f32 %v1773_v41, %v1234_v43  ;;  %v1731_v41 = vld [vmem:[%s2370_s8 + $0x5] ss:$8 sm:$0x3] }
 0xf39   :  { %1481 = vmatpush.xpose.msrb.mxu3 %v1390_v37  ;;  %v1407_v42 = vperm.slane %v1731_v41, 0  ;;  %v1408_v43 = vperm.slane %v1731_v41, 1 }
 0xf3a   :  { %1411 = vrot.lane.b32.xlu2 %v2291_v44, %s1920_s13  ;;  %1727 = vmatmul.msk.f32.vlgmr.msra.gmra.mxu2 %vm362_vm12, %v2291_v44 }
 0xf3b   :  { %1443 = vmatpush.msra.mxu2 %v1387_v46 }
 0xf3d   :  { %1444 = vmatpush.msra.mxu2 %v1385_v47  ;;  %1482 = vmatpush.xpose.msrb.mxu3 %v1388_v39 }
 0xf3f   :  { %1445 = vmatpush.msra.mxu2 %v1383_v49 }
 0xf41   :  { %1446 = vmatpush.msra.mxu2 %v1381_v48 }
 0xf42   :  { %1728 = vmatmul.msk.f32.vlgmr.msrb.gmra.mxu2 %vm362_vm12, %v2291_v44 }
 0xf43   :  { %1447 = vmatpush.msra.mxu2 %v1379_v50 }
 0xf45   :  { %1448 = vmatpush.msra.mxu2 %v1377_v51 }
 0xf47   :  { %1449 = vmatpush.msra.mxu2 %v1375_v27 }
 0xf49   :  { %1450 = vmatpush.msra.mxu2 %v1373_v52 }
 0xf4b   :  { %1495 = vmatpush.xpose.msrb.mxu2 %v1403_v6 }
 0xf4f   :  { %1496 = vmatpush.xpose.msrb.mxu2 %v1401_v9 }
 0xf53   :  { %1497 = vmatpush.xpose.msrb.mxu2 %v1399_v12 }
 0xf57   :  { %1498 = vmatpush.xpose.msrb.mxu2 %v1397_v18  ;;  %v1761_v18 = vld [vmem:[%s2364_s2 + $0x2] ss:$0 sm:$0xff] }
 0xf5b   :  { %1499 = vmatpush.xpose.msrb.mxu2 %v1395_v33 }
 0xf5f   :  { %1500 = vmatpush.xpose.msrb.mxu2 %v1393_v35 }
 0xf63   :  { %1501 = vmatpush.xpose.msrb.mxu2 %v1391_v38 }
 0xf67   :  { %1502 = vmatpush.xpose.msrb.mxu2 %v1389_v40 }
 0xf94   :  { %v1412_v58 = vpop.permute.xlu2 %1411 }
 0xf95   :  { %1732 = vmatmul.msk.f32.vlgmr.msra.gmra.mxu3 %vm362_vm12, %v1412_v58  ;;  %1733 = vmatmul.msk.f32.vlgmr.msra.gmra.mxu2 %vm362_vm12, %v1412_v58 }
 0xfbd   :  { %v1297_v13 = vpop.f32.mrf.mxu2 }
 0xfbe   :  { %v1298_v14 = vadd.f32 %v1297_v13, %v1273_v10 }
 0xfc0   :  { %v1322_v16 = vmin.f32 %v1298_v14, 0.0  ;;  %vm1320_vm2 = vcmp.gt.f32.partialorder %v1298_v14, 0.0 }
 0xfc2   :  { %v1324_v19 = vmul.f32 1.442695, %v1322_v16 }
 0xfc4   :  { %1820 = vpow2.f32 %v1324_v19 }
 0xfc5   :  { %v1317_v22 = vpop.f32.mrf.mxu2 }
 0xfc6   :  { %v1318_v55 = vadd.f32 %v1317_v22, %v1274_v21  ;;  %v189_v21 = vadd.f32 %v1761_v18, %v2136_v15 }
 0xfc8   :  { %v1323_v24 = vmin.f32 %v1318_v55, 0.0  ;;  %vm1321_vm3 = vcmp.gt.f32.partialorder %v1318_v55, 0.0  ;;  %v192_v22 = vsel %vm191_vm6, %v189_v21, -inf }
 0xfca   :  { %v1821_v25 = vpop.eup %1820  ;;  %v1326_v26 = vmul.f32 1.442695, %v1323_v24 }
 0xfcb   :  { %v1729_v23 = vadd.f32 -1.0, %v1821_v25 }
 0xfcc   :  { %1822 = vpow2.f32 %v1326_v26  ;;  %v1577_v26 = vld [vmem:[%s2368_s6 + $0x8] sm:$0xf] }
 0xfcd   :  { %v1330_v20 = vsel %vm1320_vm2, %v1298_v14, %v1729_v23  ;;  %1736 = vmatpush.xpose.msk.msrb.mxu0 %vm362_vm12, %v1577_v26  ;;  %v1576_v23 = vld [vmem:[%s2368_s6] sm:$0xff] }
 0xfce   :  { %1348 = vmatmul.f32.vlgmr.msra.gmra.mxu0 %v1330_v20  ;;  %v1615_v20 = vld [vmem:[%s2368_s6 + $0x18] sm:$0xf] }
 0xfcf   :  { %1739 = vmatpush.xpose.msk.msrb.mxu1 %vm362_vm12, %v1615_v20 }
 0xfd1   :  { %1737 = vmatpush.xpose.msk.msrb.mxu0 %vm362_vm12, %v1576_v23 }
 0xfd2   :  { %v1823_v28 = vpop.eup %1822 }
 0xfd3   :  { %v1730_v29 = vadd.f32 -1.0, %v1823_v28 }
 0xfd5   :  { %v1331_v30 = vsel %vm1321_vm3, %v1318_v55, %v1730_v29 }
 0xfd6   :  { %1368 = vmatmul.f32.vlgmr.msra.gmra.mxu1 %v1331_v30  ;;  %v1614_v30 = vld [vmem:[%s2368_s6 + $0x10] sm:$0xff] }
 0xfd7   :  { %1740 = vmatpush.xpose.msk.msrb.mxu1 %vm362_vm12, %v1614_v30 }
0x1018   :  { %v1432_v46 = vpop.f32.mrf.mxu3  ;;  %v1452_v47 = vpop.f32.mrf.mxu2 }
0x1019   :  { %v1433_v49 = vadd.f32 %v1432_v46, %v1407_v42  ;;  %v1453_v48 = vadd.f32 %v1452_v47, %v1408_v43 }
0x101b   :  { %v1457_v50 = vmin.f32 %v1433_v49, 0.0  ;;  %v1458_v51 = vmin.f32 %v1453_v48, 0.0  ;;  %vm1455_vm4 = vcmp.gt.f32.partialorder %v1433_v49, 0.0  ;;  %vm1456_vm5 = vcmp.gt.f32.partialorder %v1453_v48, 0.0 }
0x101d   :  { %v1459_v27 = vmul.f32 1.442695, %v1457_v50  ;;  %v1461_v52 = vmul.f32 1.442695, %v1458_v51 }
0x101f   :  { %1824 = vpow2.f32 %v1459_v27 }
0x1020   :  { %1826 = vpow2.f32 %v1461_v52  ;;  %v1775_v52 = vld [vmem:[%s2369_s7 + $0x10] ss:$0 sm:$0xff] }
0x1025   :  { %v1825_v53 = vpop.eup %1824 }
0x1026   :  { %v1827_v54 = vpop.eup %1826  ;;  %v1734_v56 = vadd.f32 -1.0, %v1825_v53 }
0x1027   :  { %v1735_v36 = vadd.f32 -1.0, %v1827_v54 }
0x1028   :  { %v1465_v45 = vsel %vm1455_vm4, %v1433_v49, %v1734_v56  ;;  %v1776_v56 = vld [vmem:[%s2369_s7 + $0x11] ss:$0 sm:$0xff] }
0x1029   :  { %1483 = vmatmul.f32.vlgmr.msrb.gmra.mxu3 %v1465_v45  ;;  %v1466_v57 = vsel %vm1456_vm5, %v1453_v48, %v1735_v36 }
0x102a   :  { %1503 = vmatmul.f32.vlgmr.msrb.gmra.mxu2 %v1466_v57 }
0x104b   :  { %v1349_v62 = vpop.f32.mrf.mxu0 }
0x1053   :  { %v1369_v61 = vpop.f32.mrf.mxu1 }
0x1054   :  { %v1370_v0 = vadd.f32 %v1369_v61, %v1349_v62 }
0x10ac   :  { %v1484_v58 = vpop.f32.mrf.mxu3 }
0x10ad   :  { %v1504_v59 = vpop.f32.mrf.mxu2 }
0x10ae   :  { %v1505_v60 = vadd.f32 %v1504_v59, %v1484_v58  ;;  %v1777_v58 = vld [vmem:[%s2369_s7 + $0x12] ss:$0 sm:$0xff]  ;;  %v1922_v59 = vmov 1   ;;  %s1924_s7 = smov [#allocation7]  }
0x10af   :  { %1754 = vset.pattern.permute.xlu2 %v1922_v59  ;;  %1755 = vset.pattern.permute.xlu0 %v1922_v59 }
0x10b0   :  { %1508 = vrot.lane.b32.xlu1 %v1505_v60, %s1920_s13  ;;  %v1923_v60 = vmov 0  }
0x10b1   :  { %1753 = vset.pattern.permute.xlu1 %v1923_v60 }
0x1122   :  { %v1509_v1 = vpop.permute.xlu1 %1508 }
0x1123   :  { %v1511_v2 = vsel %vm362_vm12, %v1370_v0, %v1509_v1 }
0x1124   :  { %v1514_v3 = vadd.f32 %v1774_v63, %v1511_v2 }
0x1126   :  { %v1515_v4 = vadd.f32 %v1514_v3, %v2291_v44 }
0x1128   :  { %1539 = vrot.lane.b32.xlu1 %v1515_v4, %s1920_s13  ;;  %v1516_v5 = vsel %vm302_vm1, %v1515_v4, 0.0 }
0x1129   :  { %1517 = vadd.xlane.f32.xlu2 %v1516_v5 }
0x119a   :  { %v1540_v6 = vpop.permute.xlu1 %1539 }
0x119b   :  { %v1542_v7 = vsel %vm302_vm1, %v1540_v6, 0.0 }
0x119c   :  { %1543 = vadd.xlane.f32.xlu1 %v1542_v7  ;;  %v1518_v12 = vpop.xlane.xlu2 %1517 }
0x119d   :  { %v1519_v13 = vmul.f32 %v1518_v12, %v2071_v32 }
0x119f   :  { %v1520_v44 = vsub.f32 %v1515_v4, %v1519_v13 }
0x11a1   :  { %v1521_v14 = vmul.f32 %v1520_v44, %v1520_v44 }
0x11a3   :  { %v1522_v16 = vsel %vm302_vm1, %v1521_v14, 0.0 }
0x120f   :  { %v1544_v8 = vpop.xlane.xlu1 %1543 }
0x1210   :  { %v1545_v9 = vmul.f32 %v1544_v8, %v2071_v32 }
0x1212   :  { %v1546_v10 = vsub.f32 %v1515_v4, %v1545_v9 }
0x1214   :  { %v1547_v11 = vmul.f32 %v1546_v10, %v1546_v10 }
0x1216   :  { %1549 = vrot.lane.b32.xlu0 %v1547_v11, %s1920_s13 }
0x1240   :  { %1523 = vadd.xlane.f32.xlu0 %v1522_v16 }
0x1254   :  { %1619 = vrot.lane.b32.xlu0 %v1777_v58, %s1920_s13 }
0x1288   :  { %v1550_v17 = vpop.permute.xlu0 %1549 }
0x1289   :  { %v1552_v19 = vsel %vm302_vm1, %v1550_v17, 0.0 }
0x128a   :  { %1553 = vadd.xlane.f32.xlu1 %v1552_v19 }
0x1292   :  { %193 = vmax.xlane.f32.xlu1 %v192_v22 }
0x12b3   :  { %v1524_v55 = vpop.xlane.xlu0 %1523 }
0x12b4   :  { %v1525_v24 = vmul.f32 %v1524_v55, %v2071_v32 }
0x12b6   :  { %v1526_v25 = vadd.f32 1e-05, %v1525_v24 }
0x12b8   :  { %1828 = vrsqrt.f32 %v1526_v25  ;;  %vm1533_vm7 = vweird.f32 %v1526_v25 }
0x12be   :  { %v1829_v15 = vpop.eup %1828 }
0x12bf   :  { %v1528_v28 = vmul.f32 %v1829_v15, %v1526_v25  ;;  %vm1534_vm1 = vweird.f32 %v1829_v15 }
0x12c0   :  { %vm1535_vm9 = vmor %vm1533_vm7, %vm1534_vm1 }
0x12c1   :  { %v1529_v34 = vmul.f32 %v1829_v15, %v1528_v28 }
0x12c3   :  { %v1530_v35 = vmul.f32 0.5, %v1529_v34 }
0x12c5   :  { %v1531_v41 = vsub.f32 1.5, %v1530_v35 }
0x12c6   :  { %v1620_v11 = vpop.permute.xlu0 %1619 }
0x12c7   :  { %v1532_v46 = vmul.f32 %v1829_v15, %v1531_v41 }
0x12c9   :  { %v1536_v48 = vsel %vm1535_vm9, %v1829_v15, %v1532_v46 }
0x12ca   :  { %v1537_v53 = vmul.f32 %v1536_v48, %v1520_v44 }
0x12fd   :  { %v1554_v29 = vpop.xlane.xlu1 %1553 }
0x12fe   :  { %v1555_v31 = vmul.f32 %v1554_v29, %v2071_v32 }
0x1300   :  { %v1556_v33 = vadd.f32 1e-05, %v1555_v31 }
0x1302   :  { %1830 = vrsqrt.f32 %v1556_v33  ;;  %vm1563_vm10 = vweird.f32 %v1556_v33 }
0x1305   :  { %v194_v37 = vpop.xlane.xlu1 %193 }
0x1306   :  { %v195_v38 = vsub.f32 %v189_v21, %v194_v37 }
0x1308   :  { %v1831_v39 = vpop.eup %1830  ;;  %v196_v40 = vmul.f32 1.442695, %v195_v38 }
0x1309   :  { %v1558_v42 = vmul.f32 %v1831_v39, %v1556_v33  ;;  %vm1564_vm8 = vweird.f32 %v1831_v39 }
0x130a   :  { %1832 = vpow2.f32 %v196_v40  ;;  %vm1565_vm11 = vmor %vm1563_vm10, %vm1564_vm8 }
0x130b   :  { %v1559_v43 = vmul.f32 %v1831_v39, %v1558_v42 }
0x130d   :  { %v1560_v47 = vmul.f32 0.5, %v1559_v43 }
0x130f   :  { %v1561_v49 = vsub.f32 1.5, %v1560_v47 }
0x1310   :  { %v1833_v32 = vpop.eup %1832 }
0x1311   :  { %v1562_v50 = vmul.f32 %v1831_v39, %v1561_v49  ;;  %v198_v51 = vsel %vm191_vm6, %v1833_v32, 0.0 }
0x1312   :  { %199 = vadd.xlane.f32.xlu1 %v198_v51 }
0x1313   :  { %v1566_v27 = vsel %vm1565_vm11, %v1831_v39, %v1562_v50 }
0x1314   :  { %v1567_v54 = vmul.f32 %v1566_v27, %v1546_v10 }
0x1316   :  { %v1568_v36 = vsel %vm362_vm12, %v1537_v53, %v1567_v54 }
0x1317   :  { %v1571_v45 = vmul.f32 %v1775_v52, %v1568_v36 }
0x1319   :  { %v1574_v57 = vadd.f32 %v1776_v56, %v1571_v45 }
0x131b   :  { %1616 = vrot.lane.b32.xlu2 %v1574_v57, %s1920_s13  ;;  %1738 = vmatmul.msk.f32.vlgmr.msrb.gmra.mxu0 %vm362_vm12, %v1574_v57  ;;  %s1663_s13 = sshll.u32 %s1924_s7, 4  ;;  %s1664_s13 = int_to_ptr.vmem [resolvable:$true] %s1663_s13 }
0x1375   :  { %v1617_v61 = vpop.permute.xlu2 %1616 }
0x1376   :  { %1741 = vmatmul.msk.f32.vlgmr.msrb.gmra.mxu1 %vm362_vm12, %v1617_v61  ;;  %vm1656_vm12 = vcmask 93184  }
0x1385   :  { %v200_v62 = vpop.xlane.xlu1 %199 }
0x1386   :  { %1834 = vrcp.f32 %v200_v62  ;;  %v212_v2 = vand.u32 2147483648, %v200_v62  ;;  %v210_v4 = vand.u32 2147483647, %v200_v62  ;;  %vm206_vm14 = vweird.f32 %v200_v62 }
0x1388   :  { %v213_v6 = vor.u32 1.1754944e-38, %v212_v2  ;;  %vm211_vm0 = vcmp.eq.f32.partialorder %v210_v4, 8.507059e+37 }
0x138c   :  { %v1835_v63 = vpop.eup %1834 }
0x138d   :  { %v202_v0 = vmul.f32 %v1835_v63, %v200_v62  ;;  %vm207_vm13 = vweird.f32 %v1835_v63 }
0x138e   :  { %vm208_vm15 = vmor %vm206_vm14, %vm207_vm13 }
0x138f   :  { %v203_v1 = vsub.f32 1.0, %v202_v0 }
0x1391   :  { %v204_v3 = vmul.f32 %v1835_v63, %v203_v1 }
0x1393   :  { %v205_v5 = vadd.f32 %v1835_v63, %v204_v3 }
0x1395   :  { %v209_v7 = vsel %vm208_vm15, %v1835_v63, %v205_v5 }
0x1396   :  { %v214_v8 = vsel %vm211_vm0, %v213_v6, %v209_v7 }
0x1397   :  { %v215_v9 = vmul.f32 %v1833_v32, %v214_v8 }
0x1398   :  { %v1605_v12 = vpop.f32.mrf.mxu0 }
0x1399   :  { %1651 = vperm.xlu2 %1754, %v215_v9   ;;  %1610 = vperm.xlu1 %1753, %v215_v9   ;;  %v1606_v44 = vadd.f32 %v1777_v58, %v1605_v12 }
0x13f3   :  { %v1647_v10 = vpop.f32.mrf.mxu1  ;;  %v1652_v14 = vpop.permute.xlu2 %1651 }
0x13f4   :  { %v1648_v13 = vadd.f32 %v1647_v10, %v1620_v11 }
0x13f6   :  { %v1654_v17 = vmul.f32 %v1652_v14, %v1648_v13 }
0x140b   :  { %v1611_v16 = vpop.permute.xlu1 %1610 }
0x140c   :  { %v1613_v18 = vmul.f32 %v1611_v16, %v1606_v44 }
0x140e   :  { %v1655_v19 = vadd.f32 %v1654_v17, %v1613_v18 }
0x1410   :  { %1657 = vst.msk [vmem:[#allocation7] sm:$0xf] %vm1656_vm12, %v1655_v19 }
0x1411   :  { %1668 = dma.vmem_to_hbm [thread:$0]  %s1664_s13, 64, %s1666_s16, [#allocation4]  }
0x1412   :  { %1912 = dma.done.wait [#allocation4], 64  }
0x1413   :  { %1913 = vsyncadd [#allocation4], 4294967232 }
0x1414   :  { %1673 = vsyncpa [#allocation3], 1 }
0x1415   :  { %1674 = vsyncpa [#allocation6], 1 }
0x1416   :  { %1675 = vsyncpa [#allocation4], 1 }

</bundles_post_ra>
